<compile_context>
chip_gen: v5e
topology: v5e:2x2
jax: 0.10.0
libtpu: 0.0.40
codegen_flags: <defaults>
</compile_context>

<pallas_src>
import jax
import jax.numpy as jnp
from jax.experimental import pallas as pl
from jax.experimental.pallas import tpu as pltpu


def _round_up(x, m):
    return (x + m - 1) // m * m


# ---------------------------------------------------------------------------
# Fused Pallas kernel: 3x3/s2 conv (per-tap MXU matmul, BN-scale pre-folded)
# + bias + ReLU  ||  3x3/s2 max-pool from the same taps.
# ---------------------------------------------------------------------------
def _mixed5a_kernel(p_ref, w_ref, b_ref, o_ref):
    """p_ref: (KK, tm, C) bf16 window taps; w_ref: (KK, C, N) bf16 (BN scale
    folded in); b_ref: (1, N) f32 folded BN bias; o_ref: (tm, N + C) f32 =
    [conv+BN+ReLU | maxpool]."""
    kk = p_ref.shape[0]

    tap = p_ref[0]                                             # (tm, C) bf16
    acc = jnp.dot(tap, w_ref[0], preferred_element_type=jnp.float32)
    mx = tap
    for t in range(1, kk):                                     # static unrolled taps
        tap = p_ref[t]
        acc = acc + jnp.dot(tap, w_ref[t], preferred_element_type=jnp.float32)
        mx = jnp.maximum(mx, tap)

    y = jnp.maximum(acc + b_ref[...], 0.0)                     # bias + ReLU (scale folded)
    o_ref[...] = jnp.concatenate(
        [y, mx.astype(jnp.float32)], axis=-1).astype(o_ref.dtype)


def mixed5a_fused(patches, w, bias):
    """patches: (KK, M, C) bf16; w: (KK, C, N) bf16; bias: (1, N) f32.
    Returns (M, N + C) f32: conv+BN+ReLU channels followed by max-pool channels."""
    KK, M, C = patches.shape
    N = w.shape[2]

    # Row tile: as large as 512 (big MXU LHS, few grid steps) but keep >= 4
    # grid steps when M allows so both v7x TensorCores get >= 2 steps each and
    # DMA/compute overlap is preserved.  Multiple of 16 (bf16 sublane packing).
    mp = _round_up(max(M, 16), 16)
    tm = min(512, max(16, _round_up(pl.cdiv(mp, 4), 16)))
    Mp = _round_up(M, tm)
    pp = jnp.pad(patches, ((0, 0), (0, Mp - M), (0, 0)))

    out = pl.pallas_call(
        _mixed5a_kernel,
        out_shape=jax.ShapeDtypeStruct((Mp, N + C), jnp.float32),
        grid_spec=pltpu.PrefetchScalarGridSpec(
            num_scalar_prefetch=0,
            grid=(Mp // tm,),
            in_specs=[
                pl.BlockSpec((KK, tm, C), lambda i: (0, i, 0)),   # bf16 taps
                pl.BlockSpec((KK, C, N), lambda i: (0, 0, 0)),    # full-K weights
                pl.BlockSpec((1, N), lambda i: (0, 0)),           # BN bias
            ],
            out_specs=pl.BlockSpec((tm, N + C), lambda i: (i, 0)),
        ),
        compiler_params=pltpu.CompilerParams(
            dimension_semantics=("parallel",)),
    )(pp, w, bias)
    return out[:M]   # drop padded rows (garbage conv/pool values)


# ---------------------------------------------------------------------------
# Plain-JAX glue: NCHW<->NHWC, shared 3x3/stride-2 tap extraction (slicing only)
# ---------------------------------------------------------------------------
def mixed_5a(x_nchw, params):
    """x_nchw: (B, 192, H, W) f32 -> (B, 384, Ho, Wo) f32 (NCHW, PyTorch layout)."""
    w, bias = params
    # NHWC so C=192 sits on the lane axis; bf16 once, shared by both branches.
    x = jnp.transpose(x_nchw, (0, 2, 3, 1)).astype(jnp.bfloat16)
    B, H, W, C = x.shape
    kh = kw = 3
    sh = sw = 2
    Ho = (H - kh) // sh + 1
    Wo = (W - kw) // sw + 1

    # Conv and max-pool read the *same* windows: extract the 9 taps once,
    # tap-major so the kernel reads contiguous lane-aligned (tm, C) slabs.
    taps = []
    for di in range(kh):
        for dj in range(kw):
            taps.append(x[:, di:di + sh * (Ho - 1) + 1:sh,
                          dj:dj + sw * (Wo - 1) + 1:sw, :])
    p = jnp.stack(taps, axis=0).reshape(kh * kw, B * Ho * Wo, C)

    out2d = mixed5a_fused(p, w, bias)                          # (M, 192 + 192)
    out = out2d.reshape(B, Ho, Wo, -1)
    return jnp.transpose(out, (0, 3, 1, 2))                    # back to NCHW
    # TODO(synk): if the surrounding graph can stay NHWC, drop both transposes.


# ---------------------------------------------------------------------------
# Deterministic synthetic parameters (BasicConv2d = Conv(no bias) + BN + ReLU)
# ---------------------------------------------------------------------------
def init_mixed5a_params(key, cin=192, cout=192, kh=3, kw=3):
    k1, k2, k3, k4, k5 = jax.random.split(key, 5)
    # PyTorch Conv2d weight layout (Cout, Cin, kh, kw).
    w_oihw = jax.random.normal(k1, (cout, cin, kh, kw), jnp.float32)
    w_oihw = w_oihw / jnp.sqrt(cin * kh * kw)
    # BatchNorm2d(eps=0.001) folded into inference-form scale/bias.
    gamma = jax.random.uniform(k2, (cout,), jnp.float32, 0.5, 1.5)
    beta = jax.random.normal(k3, (cout,), jnp.float32) * 0.1
    mean = jax.random.normal(k4, (cout,), jnp.float32) * 0.1
    var = jax.random.uniform(k5, (cout,), jnp.float32, 0.5, 1.5)
    eps = 1e-3
    scale = gamma / jnp.sqrt(var + eps)
    bias = beta - mean * scale
    # Fold the BN scale into the conv weights (per output channel) in f32,
    # permute to tap-major (kh*kw, Cin, Cout) matching the tap extraction
    # order, and cast ONCE to bf16 for the MXU.
    w_scaled = w_oihw * scale[:, None, None, None]
    w = jnp.transpose(w_scaled, (2, 3, 1, 0)).reshape(kh * kw, cin, cout)
    return w.astype(jnp.bfloat16), bias.reshape(1, cout)


# ---------------------------------------------------------------------------
# Pure-JAX reference (matches the in-kernel bf16 rounding of taps/weights;
# note: the pool branch is computed on bf16-rounded inputs like the kernel,
# a monotone single-ulp deviation from the f32 PyTorch pool).
# ---------------------------------------------------------------------------
def _reference(x_nchw, params):
    w, bias = params
    kh, kw = 3, 3
    cin, cout = w.shape[1], w.shape[2]
    wf = w.astype(jnp.float32).reshape(kh, kw, cin, cout)      # HWIO, scale folded
    xb = x_nchw.astype(jnp.bfloat16).astype(jnp.float32)       # kernel sees bf16 taps
    conv = jax.lax.conv_general_dilated(
        xb, wf, window_strides=(2, 2), padding="VALID",
        dimension_numbers=("NCHW", "HWIO", "NCHW"),
        precision=jax.lax.Precision.HIGHEST)
    y = jnp.maximum(conv + bias.reshape(1, -1, 1, 1), 0.0)
    pool = jax.lax.reduce_window(xb, -jnp.inf, jax.lax.max,
                                 (1, 1, 3, 3), (1, 1, 2, 2), "VALID")
    return jnp.concatenate([y, pool], axis=1)


if __name__ == "__main__":
    key = jax.random.PRNGKey(0)
    kx, kp = jax.random.split(key)
    # Channels are fixed at 192 by the module; keep batch / spatial small.
    x = jax.random.normal(kx, (2, 192, 17, 17), jnp.float32)
    params = init_mixed5a_params(kp)

    fwd = jax.jit(mixed_5a)
    out = jax.block_until_ready(fwd(x, params))

    assert out.shape == (2, 384, 8, 8), out.shape
    assert out.dtype == jnp.float32

    ref = _reference(x, params)
    err = float(jnp.max(jnp.abs(out - ref)))
    assert err < 5e-2, f"max abs err {err}"
    print("KERNEL_OK")
</pallas_src>

<mosaic_0001>
module attributes {stable_mosaic.version = 11 : i64} {
  func.func @_mixed5a_kernel(%arg0: i32, %arg1: memref<9x32x192xbf16, #tpu.memory_space<vmem>>, %arg2: memref<9x192x192xbf16, #tpu.memory_space<vmem>>, %arg3: memref<1x192xf32, #tpu.memory_space<vmem>>, %arg4: memref<32x384xf32, #tpu.memory_space<vmem>>) attributes {dimension_semantics = [#tpu.dimension_semantics<parallel>], iteration_bounds = array<i64: 4>, scalar_prefetch = 0 : i64, scratch_operands = 0 : i64, tpu.core_type = #tpu.core_type<tc>, window_params = [{transform_indices = @transform_0, window_bounds = array<i64: 9, 32, 192>}, {pipeline_mode = #tpu.pipeline_mode<synchronous>, transform_indices = @transform_1, window_bounds = array<i64: 9, 192, 192>}, {pipeline_mode = #tpu.pipeline_mode<synchronous>, transform_indices = @transform_2, window_bounds = array<i64: 1, 192>}, {transform_indices = @transform_3, window_bounds = array<i64: 32, 384>}]} {
    %c0 = arith.constant 0 : index
    %c0_0 = arith.constant 0 : index
    %c0_1 = arith.constant 0 : index
    %0 = vector.load %arg1[%c0, %c0_0, %c0_1] : memref<9x32x192xbf16, #tpu.memory_space<vmem>>, vector<1x32x192xbf16>
    %1 = vector.shape_cast %0 : vector<1x32x192xbf16> to vector<32x192xbf16>
    %c0_2 = arith.constant 0 : index
    %c0_3 = arith.constant 0 : index
    %c0_4 = arith.constant 0 : index
    %2 = vector.load %arg2[%c0_2, %c0_3, %c0_4] : memref<9x192x192xbf16, #tpu.memory_space<vmem>>, vector<1x192x192xbf16>
    %3 = vector.shape_cast %2 : vector<1x192x192xbf16> to vector<192x192xbf16>
    %cst = arith.constant dense<0.000000e+00> : vector<32x192xf32>
    %4 = tpu.matmul %1, %3, %cst {dimension_numbers = #tpu.dot_dimension_numbers<[1], [0], [0], [1], [0, 0, 1, 1], [], []>} : vector<32x192xbf16>, vector<192x192xbf16>, vector<32x192xf32> -> vector<32x192xf32>
    %c1 = arith.constant 1 : index
    %c0_5 = arith.constant 0 : index
    %c0_6 = arith.constant 0 : index
    %5 = vector.load %arg1[%c1, %c0_5, %c0_6] : memref<9x32x192xbf16, #tpu.memory_space<vmem>>, vector<1x32x192xbf16>
    %6 = vector.shape_cast %5 : vector<1x32x192xbf16> to vector<32x192xbf16>
    %c1_7 = arith.constant 1 : index
    %c0_8 = arith.constant 0 : index
    %c0_9 = arith.constant 0 : index
    %7 = vector.load %arg2[%c1_7, %c0_8, %c0_9] : memref<9x192x192xbf16, #tpu.memory_space<vmem>>, vector<1x192x192xbf16>
    %8 = vector.shape_cast %7 : vector<1x192x192xbf16> to vector<192x192xbf16>
    %cst_10 = arith.constant dense<0.000000e+00> : vector<32x192xf32>
    %9 = tpu.matmul %6, %8, %cst_10 {dimension_numbers = #tpu.dot_dimension_numbers<[1], [0], [0], [1], [0, 0, 1, 1], [], []>} : vector<32x192xbf16>, vector<192x192xbf16>, vector<32x192xf32> -> vector<32x192xf32>
    %10 = arith.addf %4, %9 : vector<32x192xf32>
    %11 = arith.maximumf %1, %6 : vector<32x192xbf16>
    %c2 = arith.constant 2 : index
    %c0_11 = arith.constant 0 : index
    %c0_12 = arith.constant 0 : index
    %12 = vector.load %arg1[%c2, %c0_11, %c0_12] : memref<9x32x192xbf16, #tpu.memory_space<vmem>>, vector<1x32x192xbf16>
    %13 = vector.shape_cast %12 : vector<1x32x192xbf16> to vector<32x192xbf16>
    %c2_13 = arith.constant 2 : index
    %c0_14 = arith.constant 0 : index
    %c0_15 = arith.constant 0 : index
    %14 = vector.load %arg2[%c2_13, %c0_14, %c0_15] : memref<9x192x192xbf16, #tpu.memory_space<vmem>>, vector<1x192x192xbf16>
    %15 = vector.shape_cast %14 : vector<1x192x192xbf16> to vector<192x192xbf16>
    %cst_16 = arith.constant dense<0.000000e+00> : vector<32x192xf32>
    %16 = tpu.matmul %13, %15, %cst_16 {dimension_numbers = #tpu.dot_dimension_numbers<[1], [0], [0], [1], [0, 0, 1, 1], [], []>} : vector<32x192xbf16>, vector<192x192xbf16>, vector<32x192xf32> -> vector<32x192xf32>
    %17 = arith.addf %10, %16 : vector<32x192xf32>
    %18 = arith.maximumf %11, %13 : vector<32x192xbf16>
    %c3 = arith.constant 3 : index
    %c0_17 = arith.constant 0 : index
    %c0_18 = arith.constant 0 : index
    %19 = vector.load %arg1[%c3, %c0_17, %c0_18] : memref<9x32x192xbf16, #tpu.memory_space<vmem>>, vector<1x32x192xbf16>
    %20 = vector.shape_cast %19 : vector<1x32x192xbf16> to vector<32x192xbf16>
    %c3_19 = arith.constant 3 : index
    %c0_20 = arith.constant 0 : index
    %c0_21 = arith.constant 0 : index
    %21 = vector.load %arg2[%c3_19, %c0_20, %c0_21] : memref<9x192x192xbf16, #tpu.memory_space<vmem>>, vector<1x192x192xbf16>
    %22 = vector.shape_cast %21 : vector<1x192x192xbf16> to vector<192x192xbf16>
    %cst_22 = arith.constant dense<0.000000e+00> : vector<32x192xf32>
    %23 = tpu.matmul %20, %22, %cst_22 {dimension_numbers = #tpu.dot_dimension_numbers<[1], [0], [0], [1], [0, 0, 1, 1], [], []>} : vector<32x192xbf16>, vector<192x192xbf16>, vector<32x192xf32> -> vector<32x192xf32>
    %24 = arith.addf %17, %23 : vector<32x192xf32>
    %25 = arith.maximumf %18, %20 : vector<32x192xbf16>
    %c4 = arith.constant 4 : index
    %c0_23 = arith.constant 0 : index
    %c0_24 = arith.constant 0 : index
    %26 = vector.load %arg1[%c4, %c0_23, %c0_24] : memref<9x32x192xbf16, #tpu.memory_space<vmem>>, vector<1x32x192xbf16>
    %27 = vector.shape_cast %26 : vector<1x32x192xbf16> to vector<32x192xbf16>
    %c4_25 = arith.constant 4 : index
    %c0_26 = arith.constant 0 : index
    %c0_27 = arith.constant 0 : index
    %28 = vector.load %arg2[%c4_25, %c0_26, %c0_27] : memref<9x192x192xbf16, #tpu.memory_space<vmem>>, vector<1x192x192xbf16>
    %29 = vector.shape_cast %28 : vector<1x192x192xbf16> to vector<192x192xbf16>
    %cst_28 = arith.constant dense<0.000000e+00> : vector<32x192xf32>
    %30 = tpu.matmul %27, %29, %cst_28 {dimension_numbers = #tpu.dot_dimension_numbers<[1], [0], [0], [1], [0, 0, 1, 1], [], []>} : vector<32x192xbf16>, vector<192x192xbf16>, vector<32x192xf32> -> vector<32x192xf32>
    %31 = arith.addf %24, %30 : vector<32x192xf32>
    %32 = arith.maximumf %25, %27 : vector<32x192xbf16>
    %c5 = arith.constant 5 : index
    %c0_29 = arith.constant 0 : index
    %c0_30 = arith.constant 0 : index
    %33 = vector.load %arg1[%c5, %c0_29, %c0_30] : memref<9x32x192xbf16, #tpu.memory_space<vmem>>, vector<1x32x192xbf16>
    %34 = vector.shape_cast %33 : vector<1x32x192xbf16> to vector<32x192xbf16>
    %c5_31 = arith.constant 5 : index
    %c0_32 = arith.constant 0 : index
    %c0_33 = arith.constant 0 : index
    %35 = vector.load %arg2[%c5_31, %c0_32, %c0_33] : memref<9x192x192xbf16, #tpu.memory_space<vmem>>, vector<1x192x192xbf16>
    %36 = vector.shape_cast %35 : vector<1x192x192xbf16> to vector<192x192xbf16>
    %cst_34 = arith.constant dense<0.000000e+00> : vector<32x192xf32>
    %37 = tpu.matmul %34, %36, %cst_34 {dimension_numbers = #tpu.dot_dimension_numbers<[1], [0], [0], [1], [0, 0, 1, 1], [], []>} : vector<32x192xbf16>, vector<192x192xbf16>, vector<32x192xf32> -> vector<32x192xf32>
    %38 = arith.addf %31, %37 : vector<32x192xf32>
    %39 = arith.maximumf %32, %34 : vector<32x192xbf16>
    %c6 = arith.constant 6 : index
    %c0_35 = arith.constant 0 : index
    %c0_36 = arith.constant 0 : index
    %40 = vector.load %arg1[%c6, %c0_35, %c0_36] : memref<9x32x192xbf16, #tpu.memory_space<vmem>>, vector<1x32x192xbf16>
    %41 = vector.shape_cast %40 : vector<1x32x192xbf16> to vector<32x192xbf16>
    %c6_37 = arith.constant 6 : index
    %c0_38 = arith.constant 0 : index
    %c0_39 = arith.constant 0 : index
    %42 = vector.load %arg2[%c6_37, %c0_38, %c0_39] : memref<9x192x192xbf16, #tpu.memory_space<vmem>>, vector<1x192x192xbf16>
    %43 = vector.shape_cast %42 : vector<1x192x192xbf16> to vector<192x192xbf16>
    %cst_40 = arith.constant dense<0.000000e+00> : vector<32x192xf32>
    %44 = tpu.matmul %41, %43, %cst_40 {dimension_numbers = #tpu.dot_dimension_numbers<[1], [0], [0], [1], [0, 0, 1, 1], [], []>} : vector<32x192xbf16>, vector<192x192xbf16>, vector<32x192xf32> -> vector<32x192xf32>
    %45 = arith.addf %38, %44 : vector<32x192xf32>
    %46 = arith.maximumf %39, %41 : vector<32x192xbf16>
    %c7 = arith.constant 7 : index
    %c0_41 = arith.constant 0 : index
    %c0_42 = arith.constant 0 : index
    %47 = vector.load %arg1[%c7, %c0_41, %c0_42] : memref<9x32x192xbf16, #tpu.memory_space<vmem>>, vector<1x32x192xbf16>
    %48 = vector.shape_cast %47 : vector<1x32x192xbf16> to vector<32x192xbf16>
    %c7_43 = arith.constant 7 : index
    %c0_44 = arith.constant 0 : index
    %c0_45 = arith.constant 0 : index
    %49 = vector.load %arg2[%c7_43, %c0_44, %c0_45] : memref<9x192x192xbf16, #tpu.memory_space<vmem>>, vector<1x192x192xbf16>
    %50 = vector.shape_cast %49 : vector<1x192x192xbf16> to vector<192x192xbf16>
    %cst_46 = arith.constant dense<0.000000e+00> : vector<32x192xf32>
    %51 = tpu.matmul %48, %50, %cst_46 {dimension_numbers = #tpu.dot_dimension_numbers<[1], [0], [0], [1], [0, 0, 1, 1], [], []>} : vector<32x192xbf16>, vector<192x192xbf16>, vector<32x192xf32> -> vector<32x192xf32>
    %52 = arith.addf %45, %51 : vector<32x192xf32>
    %53 = arith.maximumf %46, %48 : vector<32x192xbf16>
    %c8 = arith.constant 8 : index
    %c0_47 = arith.constant 0 : index
    %c0_48 = arith.constant 0 : index
    %54 = vector.load %arg1[%c8, %c0_47, %c0_48] : memref<9x32x192xbf16, #tpu.memory_space<vmem>>, vector<1x32x192xbf16>
    %55 = vector.shape_cast %54 : vector<1x32x192xbf16> to vector<32x192xbf16>
    %c8_49 = arith.constant 8 : index
    %c0_50 = arith.constant 0 : index
    %c0_51 = arith.constant 0 : index
    %56 = vector.load %arg2[%c8_49, %c0_50, %c0_51] : memref<9x192x192xbf16, #tpu.memory_space<vmem>>, vector<1x192x192xbf16>
    %57 = vector.shape_cast %56 : vector<1x192x192xbf16> to vector<192x192xbf16>
    %cst_52 = arith.constant dense<0.000000e+00> : vector<32x192xf32>
    %58 = tpu.matmul %55, %57, %cst_52 {dimension_numbers = #tpu.dot_dimension_numbers<[1], [0], [0], [1], [0, 0, 1, 1], [], []>} : vector<32x192xbf16>, vector<192x192xbf16>, vector<32x192xf32> -> vector<32x192xf32>
    %59 = arith.addf %52, %58 : vector<32x192xf32>
    %60 = arith.maximumf %53, %55 : vector<32x192xbf16>
    %c0_53 = arith.constant 0 : index
    %c0_54 = arith.constant 0 : index
    %61 = vector.load %arg3[%c0_53, %c0_54] : memref<1x192xf32, #tpu.memory_space<vmem>>, vector<1x192xf32>
    %62 = vector.broadcast %61 : vector<1x192xf32> to vector<32x192xf32>
    %63 = arith.addf %59, %62 : vector<32x192xf32>
    %cst_55 = arith.constant 0.000000e+00 : f32
    %64 = vector.broadcast %cst_55 : f32 to vector<32x192xf32>
    %65 = arith.maximumf %63, %64 : vector<32x192xf32>
    %66 = arith.extf %60 : vector<32x192xbf16> to vector<32x192xf32>
    %67 = tpu.concatenate %65, %66 in 1 : vector<32x192xf32>, vector<32x192xf32> -> vector<32x384xf32>
    %c0_56 = arith.constant 0 : index
    %c0_57 = arith.constant 0 : index
    %68 = vector.load %arg4[%c0_56, %c0_57] : memref<32x384xf32, #tpu.memory_space<vmem>>, vector<32x384xf32>
    tpu.vector_store %arg4[%c0_56, %c0_57], %67 {strides = array<i32>} : memref<32x384xf32, #tpu.memory_space<vmem>>, vector<32x384xf32>,
    return
  }
  func.func @transform_0(%arg0: i32) -> (i32, i32, i32) {
    %c0_i32 = arith.constant 0 : i32
    %c0_i32_0 = arith.constant 0 : i32
    %c0_i32_1 = arith.constant 0 : i32
    return %c0_i32, %arg0, %c0_i32_0 : i32, i32, i32
  }
  func.func @transform_1(%arg0: i32) -> (i32, i32, i32) {
    %c0_i32 = arith.constant 0 : i32
    %c0_i32_0 = arith.constant 0 : i32
    %c0_i32_1 = arith.constant 0 : i32
    %c0_i32_2 = arith.constant 0 : i32
    return %c0_i32, %c0_i32_0, %c0_i32_1 : i32, i32, i32
  }
  func.func @transform_2(%arg0: i32) -> (i32, i32) {
    %c0_i32 = arith.constant 0 : i32
    %c0_i32_0 = arith.constant 0 : i32
    %c0_i32_1 = arith.constant 0 : i32
    return %c0_i32, %c0_i32_0 : i32, i32
  }
  func.func @transform_3(%arg0: i32) -> (i32, i32) {
    %c0_i32 = arith.constant 0 : i32
    %c0_i32_0 = arith.constant 0 : i32
    return %arg0, %c0_i32 : i32, i32
  }
}

</mosaic_0001>

<bundles_post_ra>
// kernel: mixed_5a.1
= control target key start
LH: loop header
LB: loop body
LE: loop exit
PB: predicated region body
PF: predicated region fallthrough
CT: control target
= control target key end

     0   :  { %8 = vsyncpa [#allocation4], 0  ;;  %s6726_s0 = inlined_call_operand.vmem [shape: bf16[9,128,192], index: 0, kind: input, shape index: {}]   ;;  %s6727_s1 = inlined_call_operand.vmem [shape: bf16[9,192,192], index: 1, kind: input, shape index: {}]   ;;  %s6728_s2 = inlined_call_operand.vmem [shape: f32[1,192], index: 2, kind: input, shape index: {}]   ;;  %s6729_s3 = inlined_call_operand.hbm [shape: f32[128,384], index: 3, kind: output, shape index: {}]  }
   0x1   :  { %10 = vsyncpa [#allocation4 + $0x1], 0  ;;  %s4732_s12 = smov 0   ;;  %s4734_s13 = smov 0  }
   0x2   :  { %s4736_s14 = smov 0   ;;  %s4738_s15 = smov 0  }
   0x3 LB: > { %s3044_s16 = sadd.s32 4294967295, %s4707_s15   ;;  %s3045_s17 = sadd.s32 4294967294, %s4707_s15   ;;  %s4707_s15 = sphi %s4738_s15, %s6735_s15   ;;  %s4703_s14 = sphi %s4736_s14, %s6734_s14   ;;  %s4699_s13 = sphi %s4734_s13, %s6733_s13   ;;  %s4695_s12 = sphi %s4732_s12, %s6732_s12  }
   0x4   : > { %s4755_s18 = sadd.s32 1, %s4707_s15   ;;  %s23_s19 = sadd.s32 1, %s4703_s14 }
   0x5   : > { %s20_s20 = ssub.s32 %s4707_s15, %s4755_s18  ;;  %p30_p0 = scmp.ne.s32.totalorder %s4703_s14, %s4699_s13 }
   0x6   : > { %p21_p1 = scmp.eq.s32.totalorder %s20_s20, 0  ;;  %p31_p2 = scmp.eq.s32.totalorder %s4707_s15, 0 }
   0x7   : > { %p102_p3 = scmp.eq.s32.totalorder %s3044_s16, 3  ;;  %p107_p4 = scmp.ne.s32.totalorder %s4699_s13, %s4695_s12 }
   0x8   : > { %s4768_s21 = scalar_select %p21_p1, %s4703_s14, %s23_s19  }
   0x9   : > { %p32_p5 = por %p31_p2, %p30_p0  ;;  %p4770_p6 = por %p102_p3, %p30_p0 }
   0xa   : > { %p108_p7 = scmp.eq.s32.totalorder %s3045_s17, 3  ;;  %p3047_p9 = scmp.ge.s32.totalorder %s4707_s15, 4 }
   0xc   : > { %p4774_p8 = por %p108_p7, %p107_p4  ;;  %130 = sbr.rel (%p3047_p9) target bundleno = 57 (0x39), region = 24 }
  0x11   : > { %133 = sbr.rel (!%p32_p5) target bundleno = 57 (0x39), region = 28  ;;  %s135_s24 = sand.u32 (%p32_p5), 1, %s4703_s14  }
  0x12   : > { %s4326_s25 = sshll.u32 (%p32_p5), %s4707_s15, 5  ;;  %s4579_s26 = smul.u32 (%p32_p5), 288, %s135_s24 }
  0x13   : > { %s4784_s29 = scalar_lea.vmem (%p32_p5), %s6726_s0, %s4326_s25 }
  0x14   : > { %v240_v0 = vld [vmem:[%s4784_s29] sm:$0xff] (%p32_p5)  ;;  %v242_v1 = vld [vmem:[%s4784_s29 + $0x8] sm:$0xff] (%p32_p5)  ;;  %v244_v2 = vld [vmem:[%s4784_s29 + $0x10] sm:$0xff] (%p32_p5)  ;;  %s4789_s30 = scalar_lea.vmem (%p32_p5), [#allocation2], %s4579_s26 }
  0x15   : > { %241 = vst [vmem:[%s4789_s30] sm:$0xff] (%p32_p5), %v240_v0  ;;  %v246_v3 = vld [vmem:[%s4784_s29 + $0x18] sm:$0xff] (%p32_p5)  ;;  %v248_v4 = vld [vmem:[%s4784_s29 + $0x80] sm:$0xff] (%p32_p5)  ;;  %v250_v5 = vld [vmem:[%s4784_s29 + $0x88] sm:$0xff] (%p32_p5) }
  0x16   : > { %243 = vst [vmem:[%s4789_s30 + $0x8] sm:$0xff] %v242_v1  ;;  %v252_v6 = vld [vmem:[%s4784_s29 + $0x90] sm:$0xff]  ;;  %v254_v7 = vld [vmem:[%s4784_s29 + $0x98] sm:$0xff]  ;;  %v256_v8 = vld [vmem:[%s4784_s29 + $0x100] sm:$0xff] }
  0x17   : > { %245 = vst [vmem:[%s4789_s30 + $0x10] sm:$0xff] %v244_v2  ;;  %v258_v9 = vld [vmem:[%s4784_s29 + $0x108] sm:$0xff]  ;;  %v260_v10 = vld [vmem:[%s4784_s29 + $0x110] sm:$0xff]  ;;  %v262_v11 = vld [vmem:[%s4784_s29 + $0x118] sm:$0xff] }
  0x18   : > { %247 = vst [vmem:[%s4789_s30 + $0x18] sm:$0xff] %v246_v3  ;;  %v264_v12 = vld [vmem:[%s4784_s29 + $0x180] sm:$0xff]  ;;  %v266_v13 = vld [vmem:[%s4784_s29 + $0x188] sm:$0xff]  ;;  %v268_v14 = vld [vmem:[%s4784_s29 + $0x190] sm:$0xff] }
  0x19   : > { %249 = vst [vmem:[%s4789_s30 + $0x20] sm:$0xff] %v248_v4  ;;  %v270_v15 = vld [vmem:[%s4784_s29 + $0x198] sm:$0xff]  ;;  %v272_v16 = vld [vmem:[%s4784_s29 + $0x200] sm:$0xff]  ;;  %v274_v17 = vld [vmem:[%s4784_s29 + $0x208] sm:$0xff] }
  0x1a   : > { %251 = vst [vmem:[%s4789_s30 + $0x28] sm:$0xff] %v250_v5  ;;  %v276_v18 = vld [vmem:[%s4784_s29 + $0x210] sm:$0xff]  ;;  %v278_v19 = vld [vmem:[%s4784_s29 + $0x218] sm:$0xff]  ;;  %v280_v20 = vld [vmem:[%s4784_s29 + $0x280] sm:$0xff] }
  0x1b   : > { %253 = vst [vmem:[%s4789_s30 + $0x30] sm:$0xff] %v252_v6  ;;  %v282_v21 = vld [vmem:[%s4784_s29 + $0x288] sm:$0xff]  ;;  %v284_v22 = vld [vmem:[%s4784_s29 + $0x290] sm:$0xff]  ;;  %v286_v23 = vld [vmem:[%s4784_s29 + $0x298] sm:$0xff] }
  0x1c   : > { %255 = vst [vmem:[%s4789_s30 + $0x38] sm:$0xff] %v254_v7  ;;  %v288_v24 = vld [vmem:[%s4784_s29 + $0x300] sm:$0xff]  ;;  %v290_v25 = vld [vmem:[%s4784_s29 + $0x308] sm:$0xff]  ;;  %v292_v26 = vld [vmem:[%s4784_s29 + $0x310] sm:$0xff] }
  0x1d   : > { %257 = vst [vmem:[%s4789_s30 + $0x40] sm:$0xff] %v256_v8  ;;  %v294_v27 = vld [vmem:[%s4784_s29 + $0x318] sm:$0xff]  ;;  %v296_v28 = vld [vmem:[%s4784_s29 + $0x380] sm:$0xff]  ;;  %v298_v29 = vld [vmem:[%s4784_s29 + $0x388] sm:$0xff] }
  0x1e   : > { %259 = vst [vmem:[%s4789_s30 + $0x48] sm:$0xff] %v258_v9  ;;  %v300_v30 = vld [vmem:[%s4784_s29 + $0x390] sm:$0xff]  ;;  %v302_v31 = vld [vmem:[%s4784_s29 + $0x398] sm:$0xff]  ;;  %v304_v32 = vld [vmem:[%s4784_s29 + $0x400] sm:$0xff] }
  0x1f   : > { %261 = vst [vmem:[%s4789_s30 + $0x50] sm:$0xff] %v260_v10  ;;  %v306_v33 = vld [vmem:[%s4784_s29 + $0x408] sm:$0xff]  ;;  %v308_v34 = vld [vmem:[%s4784_s29 + $0x410] sm:$0xff]  ;;  %v310_v35 = vld [vmem:[%s4784_s29 + $0x418] sm:$0xff] }
  0x20   : > { %263 = vst [vmem:[%s4789_s30 + $0x58] sm:$0xff] %v262_v11 }
  0x21   : > { %265 = vst [vmem:[%s4789_s30 + $0x60] sm:$0xff] %v264_v12 }
  0x22   : > { %267 = vst [vmem:[%s4789_s30 + $0x68] sm:$0xff] %v266_v13 }
  0x23   : > { %269 = vst [vmem:[%s4789_s30 + $0x70] sm:$0xff] %v268_v14 }
  0x24   : > { %271 = vst [vmem:[%s4789_s30 + $0x78] sm:$0xff] %v270_v15 }
  0x25   : > { %273 = vst [vmem:[%s4789_s30 + $0x80] sm:$0xff] %v272_v16 }
  0x26   : > { %275 = vst [vmem:[%s4789_s30 + $0x88] sm:$0xff] %v274_v17 }
  0x27   : > { %277 = vst [vmem:[%s4789_s30 + $0x90] sm:$0xff] %v276_v18 }
  0x28   : > { %279 = vst [vmem:[%s4789_s30 + $0x98] sm:$0xff] %v278_v19 }
  0x29   : > { %281 = vst [vmem:[%s4789_s30 + $0xa0] sm:$0xff] %v280_v20 }
  0x2a   : > { %283 = vst [vmem:[%s4789_s30 + $0xa8] sm:$0xff] %v282_v21 }
  0x2b   : > { %285 = vst [vmem:[%s4789_s30 + $0xb0] sm:$0xff] %v284_v22 }
  0x2c   : > { %287 = vst [vmem:[%s4789_s30 + $0xb8] sm:$0xff] %v286_v23 }
  0x2d   : > { %289 = vst [vmem:[%s4789_s30 + $0xc0] sm:$0xff] %v288_v24 }
  0x2e   : > { %291 = vst [vmem:[%s4789_s30 + $0xc8] sm:$0xff] %v290_v25 }
  0x2f   : > { %293 = vst [vmem:[%s4789_s30 + $0xd0] sm:$0xff] %v292_v26 }
  0x30   : > { %295 = vst [vmem:[%s4789_s30 + $0xd8] sm:$0xff] %v294_v27 }
  0x31   : > { %297 = vst [vmem:[%s4789_s30 + $0xe0] sm:$0xff] %v296_v28 }
  0x32   : > { %299 = vst [vmem:[%s4789_s30 + $0xe8] sm:$0xff] %v298_v29 }
  0x33   : > { %301 = vst [vmem:[%s4789_s30 + $0xf0] sm:$0xff] %v300_v30 }
  0x34   : > { %303 = vst [vmem:[%s4789_s30 + $0xf8] sm:$0xff] %v302_v31 }
  0x35   : > { %305 = vst [vmem:[%s4789_s30 + $0x100] sm:$0xff] %v304_v32 }
  0x36   : > { %307 = vst [vmem:[%s4789_s30 + $0x108] sm:$0xff] %v306_v33 }
  0x37   : > { %309 = vst [vmem:[%s4789_s30 + $0x110] sm:$0xff] %v308_v34 }
  0x38   : > { %311 = vst [vmem:[%s4789_s30 + $0x118] sm:$0xff] %v310_v35 }
  0x39 PF: > { %p3051_p10 = scmp.ge.s32.totalorder %s4707_s15, 1  ;;  %p316_p11 = scmp.lt.s32.totalorder %s4707_s15, 5 }
  0x3b   : > { %p317_p12 = pnand %p3051_p10, %p316_p11 }
  0x3c   : > { %s4959_s20 = sand.u32 (!%p317_p12), 1, %s4699_s13   ;;  %s4582_s29 = smul.u32 (!%p317_p12), 96, %s3044_s16 }
  0x3d   : > { %320 = sbr.rel (%p317_p12) target bundleno = 531 (0x213), region = 66  ;;  %s2961_s7 = scalar_lea.sflag (!%p317_p12), [#allocation4], %s4959_s20 }
  0x3e   : > { %s4580_s24 = smul.u32 (!%p317_p12), 288, %s4959_s20  ;;  %s2973_s5 = scalar_lea.hbm (!%p317_p12), %s6729_s3, %s4582_s29 }
  0x3f   : > { %s2976_s6 = sshll.u32 (!%p317_p12), %s2973_s5, 4  ;;  %s4665_s19 = scalar_lea.hbm (!%p317_p12), %s6729_s3, 384  ;;  %s2977_s6 = int_to_ptr.hbm [resolvable:$true] %s2976_s6 }
  0x40   : > { %s4980_s10 = scalar_lea.vmem (!%p317_p12), [#allocation2], %s4580_s24  ;;  %s4709_s24 = smov (!%p317_p12), 64  }
  0x41   : > { %s4659_s8 = sshra.s32 (!%p317_p12), %s2977_s6, 4  ;;  %s4660_s8 = int_to_ptr.hbm [resolvable:$true] %s4659_s8 }
  0x42   : > { %v3154_v36 = vld [vmem:[%s6727_s1 + $0x130] sm:$0xf]  ;;  %v4374_v37 = vld [vmem:[%s6727_s1 + $0x134] sm:$0xf0]  ;;  %v4373_v41 = vld [vmem:[%s6727_s1 + $0x134] sm:$0xf]  ;;  %p4666_p2 = scmp.lt.s32.totalorder %s4660_s8, %s6729_s3 }
  0x43   : > { %v3186_v38 = vld [vmem:[%s6727_s1 + $0x170] sm:$0xf]  ;;  %v3155_v39 = vor.u32 %v4374_v37, %v3154_v36  ;;  %v4382_v40 = vld [vmem:[%s6727_s1 + $0x174] sm:$0xf0]  ;;  %v3156_v42 = vld [vmem:[%s6727_s1 + $0x138] sm:$0xf0] }
  0x44   : > { %v3187_v43 = vor.u32 %v4382_v40, %v3186_v38  ;;  %v3159_v44 = vor.u32 %v4373_v41, %v3156_v42  ;;  %v4381_v45 = vld [vmem:[%s6727_s1 + $0x174] sm:$0xf]  ;;  %v3188_v46 = vld [vmem:[%s6727_s1 + $0x178] sm:$0xf0]  ;;  %v3146_v47 = vld [vmem:[%s6727_s1 + $0x120] sm:$0xf] }
  0x45   : > { %552 = vmatpush.bf16.msra.mxu0 %v3155_v39  ;;  %v3191_v48 = vor.u32 %v4381_v45, %v3188_v46  ;;  %v4372_v49 = vld [vmem:[%s6727_s1 + $0x124] sm:$0xf0]  ;;  %v3178_v50 = vld [vmem:[%s6727_s1 + $0x160] sm:$0xf]  ;;  %v4371_v54 = vld [vmem:[%s6727_s1 + $0x124] sm:$0xf] }
  0x46   : > { %v4380_v51 = vld [vmem:[%s6727_s1 + $0x164] sm:$0xf0]  ;;  %575 = vmatpush.bf16.msra.mxu1 %v3187_v43  ;;  %590 = vmatpush.bf16.msra.mxu2 %v3159_v44  ;;  %v3147_v52 = vor.u32 %v4372_v49, %v3146_v47  ;;  %v3148_v55 = vld [vmem:[%s6727_s1 + $0x128] sm:$0xf0]  ;;  %v4379_v56 = vld [vmem:[%s6727_s1 + $0x164] sm:$0xf] }
  0x47   : > { %v3179_v53 = vor.u32 %v4380_v51, %v3178_v50  ;;  %613 = vmatpush.bf16.msra.mxu3 %v3191_v48  ;;  %v3151_v57 = vor.u32 %v4371_v54, %v3148_v55  ;;  %v3180_v58 = vld [vmem:[%s6727_s1 + $0x168] sm:$0xf0]  ;;  %v3138_v59 = vld [vmem:[%s6727_s1 + $0x110] sm:$0xf]  ;;  %v4370_v60 = vld [vmem:[%s6727_s1 + $0x114] sm:$0xf0] }
  0x48   : > { %v3183_v61 = vor.u32 %v4379_v56, %v3180_v58  ;;  %v3170_v62 = vld [vmem:[%s6727_s1 + $0x150] sm:$0xf]  ;;  %v4378_v63 = vld [vmem:[%s6727_s1 + $0x154] sm:$0xf0]  ;;  %v4369_v0 = vld [vmem:[%s6727_s1 + $0x114] sm:$0xf]  ;;  %v3139_v1 = vor.u32 %v4370_v60, %v3138_v59 }
  0x49   : > { %553 = vmatpush.bf16.msra.mxu0 %v3147_v52  ;;  %v3140_v2 = vld [vmem:[%s6727_s1 + $0x118] sm:$0xf0]  ;;  %v4377_v3 = vld [vmem:[%s6727_s1 + $0x154] sm:$0xf]  ;;  %v3171_v5 = vor.u32 %v4378_v63, %v3170_v62  ;;  %v3130_v7 = vld [vmem:[%s6727_s1 + $0x100] sm:$0xf] }
  0x4a   : > { %v3172_v4 = vld [vmem:[%s6727_s1 + $0x158] sm:$0xf0]  ;;  %576 = vmatpush.bf16.msra.mxu1 %v3179_v53  ;;  %591 = vmatpush.bf16.msra.mxu2 %v3151_v57  ;;  %v3143_v6 = vor.u32 %v4369_v0, %v3140_v2  ;;  %v4368_v8 = vld [vmem:[%s6727_s1 + $0x104] sm:$0xf0]  ;;  %v3162_v9 = vld [vmem:[%s6727_s1 + $0x140] sm:$0xf] }
  0x4b   : > { %614 = vmatpush.bf16.msra.mxu3 %v3183_v61  ;;  %v3175_v10 = vor.u32 %v4377_v3, %v3172_v4  ;;  %v4376_v11 = vld [vmem:[%s6727_s1 + $0x144] sm:$0xf0]  ;;  %v4367_v12 = vld [vmem:[%s6727_s1 + $0x104] sm:$0xf]  ;;  %v3132_v13 = vld [vmem:[%s6727_s1 + $0x108] sm:$0xf0]  ;;  %v3131_v16 = vor.u32 %v4368_v8, %v3130_v7 }
  0x4c   : > { %v4375_v14 = vld [vmem:[%s6727_s1 + $0x144] sm:$0xf]  ;;  %v3164_v15 = vld [vmem:[%s6727_s1 + $0x148] sm:$0xf0]  ;;  %v3122_v17 = vld [vmem:[%s6727_s1 + $0xf0] sm:$0xf]  ;;  %v3163_v18 = vor.u32 %v4376_v11, %v3162_v9  ;;  %v3135_v19 = vor.u32 %v4367_v12, %v3132_v13 }
  0x4d   : > { %554 = vmatpush.bf16.msra.mxu0 %v3139_v1  ;;  %v4366_v20 = vld [vmem:[%s6727_s1 + $0xf4] sm:$0xf0]  ;;  %v4365_v21 = vld [vmem:[%s6727_s1 + $0xf4] sm:$0xf]  ;;  %v3270_v22 = vld [vmem:[%s6727_s1 + $0x70] sm:$0xf]  ;;  %v3167_v23 = vor.u32 %v4375_v14, %v3164_v15 }
  0x4e   : > { %577 = vmatpush.bf16.msra.mxu1 %v3171_v5  ;;  %592 = vmatpush.bf16.msra.mxu2 %v3143_v6  ;;  %v3124_v24 = vld [vmem:[%s6727_s1 + $0xf8] sm:$0xf0]  ;;  %v4346_v25 = vld [vmem:[%s6727_s1 + $0x74] sm:$0xf0]  ;;  %v4355_v26 = vld [vmem:[%s4980_s10 + $0x24] sm:$0xf]  ;;  %v3123_v30 = vor.u32 %v4366_v20, %v3122_v17 }
  0x4f   : > { %615 = vmatpush.bf16.msra.mxu3 %v3175_v10  ;;  %v3084_v27 = vld [vmem:[%s4980_s10 + $0x28] sm:$0xf0]  ;;  %v3271_v28 = vor.u32 %v4346_v25, %v3270_v22  ;;  %vm545_vm0 = vcmask 523264   ;;  %v3262_v31 = vld [vmem:[%s6727_s1 + $0x60] sm:$0xf]  ;;  %v3127_v32 = vor.u32 %v4365_v21, %v3124_v24  ;;  %s4661_s9 = scalar_lea.hbm %s4660_s8, 96 }
  0x50   : > { %v3087_v29 = vor.u32 %v4355_v26, %v3084_v27  ;;  %v3114_v33 = vld [vmem:[%s6727_s1 + $0xe0] sm:$0xf]  ;;  %v4364_v34 = vld [vmem:[%s6727_s1 + $0xe4] sm:$0xf0]  ;;  %v4363_v36 = vld [vmem:[%s6727_s1 + $0xe4] sm:$0xf]  ;;  %p4662_p13 = scmp.ne.s32.totalorder %s4660_s8, %s4661_s9  ;;  %p4667_p3 = scmp.lt.s32.totalorder %s4665_s19, %s4661_s9 }
  0x51   : > { %555 = vmatpush.bf16.msra.mxu0 %v3131_v16  ;;  %v4344_v35 = vld [vmem:[%s6727_s1 + $0x64] sm:$0xf0]  ;;  %v3116_v37 = vld [vmem:[%s6727_s1 + $0xe8] sm:$0xf0]  ;;  %v3254_v39 = vld [vmem:[%s6727_s1 + $0x50] sm:$0xf]  ;;  %v3115_v41 = vor.u32 %v4364_v34, %v3114_v33 }
  0x52   : > { %578 = vmatpush.bf16.msra.mxu1 %v3163_v18  ;;  %593 = vmatpush.bf16.msra.mxu2 %v3135_v19  ;;  %v3263_v38 = vor.u32 %v4344_v35, %v3262_v31  ;;  %v4342_v40 = vld [vmem:[%s6727_s1 + $0x54] sm:$0xf0]  ;;  %v3119_v42 = vor.u32 %v4363_v36, %v3116_v37  ;;  %v3106_v43 = vld [vmem:[%s6727_s1 + $0xd0] sm:$0xf]  ;;  %v4361_v45 = vld [vmem:[%s6727_s1 + $0xd4] sm:$0xf]  ;;  %p4663_p0 = pnand %p4662_p13, %p4770_p6  ;;  %p4668_p4 = por %p4667_p3, %p4666_p2 }
  0x53   : > { %616 = vmatpush.bf16.msra.mxu3 %v3167_v23  ;;  %v4362_v44 = vld [vmem:[%s6727_s1 + $0xd4] sm:$0xf0]  ;;  %v3108_v46 = vld [vmem:[%s6727_s1 + $0xd8] sm:$0xf0]  ;;  %v3255_v47 = vor.u32 %v4342_v40, %v3254_v39  ;;  %v3098_v48 = vld [vmem:[%s6727_s1 + $0xc0] sm:$0xf] }
  0x54   : > { %v4360_v49 = vld [vmem:[%s6727_s1 + $0xc4] sm:$0xf0]  ;;  %v3246_v50 = vld [vmem:[%s6727_s1 + $0x40] sm:$0xf]  ;;  %v3107_v52 = vor.u32 %v4362_v44, %v3106_v43  ;;  %v4359_v53 = vld [vmem:[%s6727_s1 + $0xc4] sm:$0xf]  ;;  %v3111_v56 = vor.u32 %v4361_v45, %v3108_v46  ;;  %p4664_p1 = pneg %p4663_p0 }
  0x55   : > { %3192 = vmatmul.msk.bf16.vlgmr.msra.gmra.mxu1 %vm545_vm0, %v3087_v29  ;;  %556 = vmatpush.bf16.msra.mxu0 %v3123_v30  ;;  %v4340_v51 = vld [vmem:[%s6727_s1 + $0x44] sm:$0xf0]  ;;  %v3302_v54 = vld [vmem:[%s6727_s1 + $0xb0] sm:$0xf]  ;;  %v4354_v55 = vld [vmem:[%s6727_s1 + $0xb4] sm:$0xf0]  ;;  %v3099_v5 = vor.u32 %v4360_v49, %v3098_v48 }
  0x56   : > { %772 = vmatpush.bf16.msrb.mxu1 %v3271_v28  ;;  %3194 = vmatmul.msk.bf16.vlgmr.msra.gmra.mxu3 %vm545_vm0, %v3087_v29  ;;  %v3100_v57 = vld [vmem:[%s6727_s1 + $0xc8] sm:$0xf0]  ;;  %v4353_v58 = vld [vmem:[%s6727_s1 + $0xb4] sm:$0xf]  ;;  %v3303_v59 = vor.u32 %v4354_v55, %v3302_v54  ;;  %v3247_v61 = vor.u32 %v4340_v51, %v3246_v50  ;;  %v3272_v62 = vld [vmem:[%s6727_s1 + $0x78] sm:$0xf0]  ;;  %p4669_p5 = pnand %p4668_p4, %p4664_p1 }
  0x57   : > { %594 = vmatpush.bf16.msra.mxu2 %v3127_v32  ;;  %v4345_v60 = vld [vmem:[%s6727_s1 + $0x74] sm:$0xf]  ;;  %v3294_v63 = vld [vmem:[%s6727_s1 + $0xa0] sm:$0xf]  ;;  %v4352_v0 = vld [vmem:[%s6727_s1 + $0xa4] sm:$0xf0]  ;;  %v3103_v9 = vor.u32 %v4359_v53, %v3100_v57 }
  0x58   : > { %v3304_v1 = vld [vmem:[%s6727_s1 + $0xb8] sm:$0xf0]  ;;  %v3238_v2 = vld [vmem:[%s6727_s1 + $0x30] sm:$0xf]  ;;  %v4338_v3 = vld [vmem:[%s6727_s1 + $0x34] sm:$0xf0]  ;;  %795 = vmatpush.bf16.msrb.mxu3 %v3303_v59  ;;  %v3295_v4 = vor.u32 %v4352_v0, %v3294_v63  ;;  %v3275_v12 = vor.u32 %v4345_v60, %v3272_v62 }
  0x59   : > { %557 = vmatpush.bf16.msra.mxu0 %v3115_v41  ;;  %v3082_v6 = vld [vmem:[%s4980_s10 + $0x20] sm:$0xf]  ;;  %v4356_v7 = vld [vmem:[%s4980_s10 + $0x24] sm:$0xf0]  ;;  %v3286_v8 = vld [vmem:[%s6727_s1 + $0x90] sm:$0xf]  ;;  %v3307_v14 = vor.u32 %v4353_v58, %v3304_v1  ;;  %v3239_v15 = vor.u32 %v4338_v3, %v3238_v2 }
  0x5a   : > { %773 = vmatpush.bf16.msrb.mxu1 %v3263_v38  ;;  %v4357_v10 = vld [vmem:[%s4980_s10 + $0x34] sm:$0xf]  ;;  %v3092_v11 = vld [vmem:[%s4980_s10 + $0x38] sm:$0xf0]  ;;  %v4350_v13 = vld [vmem:[%s6727_s1 + $0x94] sm:$0xf0]  ;;  %v3083_v19 = vor.u32 %v4356_v7, %v3082_v6 }
  0x5b   : > { %595 = vmatpush.bf16.msra.mxu2 %v3119_v42  ;;  %v3230_v16 = vld [vmem:[%s6727_s1 + $0x20] sm:$0xf]  ;;  %v4343_v17 = vld [vmem:[%s6727_s1 + $0x64] sm:$0xf]  ;;  %v3264_v18 = vld [vmem:[%s6727_s1 + $0x68] sm:$0xf0]  ;;  %v3287_v23 = vor.u32 %v4350_v13, %v3286_v8  ;;  %v3095_v24 = vor.u32 %v4357_v10, %v3092_v11 }
  0x5c   : > { %v4336_v20 = vld [vmem:[%s6727_s1 + $0x24] sm:$0xf0]  ;;  %796 = vmatpush.bf16.msrb.mxu3 %v3295_v4  ;;  %v4351_v21 = vld [vmem:[%s6727_s1 + $0xa4] sm:$0xf]  ;;  %v3296_v22 = vld [vmem:[%s6727_s1 + $0xa8] sm:$0xf0]  ;;  %v3267_v27 = vor.u32 %v4343_v17, %v3264_v18 }
  0x5d   : > { %558 = vmatpush.bf16.msra.mxu0 %v3107_v52  ;;  %v3278_v25 = vld [vmem:[%s6727_s1 + $0x80] sm:$0xf]  ;;  %v4348_v26 = vld [vmem:[%s6727_s1 + $0x84] sm:$0xf0]  ;;  %v3231_v28 = vor.u32 %v4336_v20, %v3230_v16  ;;  %v3299_v29 = vor.u32 %v4351_v21, %v3296_v22  ;;  %v3222_v30 = vld [vmem:[%s6727_s1 + $0x10] sm:$0xf] }
  0x5e   : > { %774 = vmatpush.bf16.msrb.mxu1 %v3255_v47  ;;  %v4341_v31 = vld [vmem:[%s6727_s1 + $0x54] sm:$0xf]  ;;  %v3256_v32 = vld [vmem:[%s6727_s1 + $0x58] sm:$0xf0]  ;;  %v4334_v33 = vld [vmem:[%s6727_s1 + $0x14] sm:$0xf0]  ;;  %v3279_v34 = vor.u32 %v4348_v26, %v3278_v25 }
  0x5f   : > { %596 = vmatpush.bf16.msra.mxu2 %v3111_v56  ;;  %v4349_v35 = vld [vmem:[%s6727_s1 + $0x94] sm:$0xf]  ;;  %v3288_v36 = vld [vmem:[%s6727_s1 + $0x98] sm:$0xf0]  ;;  %v3259_v37 = vor.u32 %v4341_v31, %v3256_v32  ;;  %v3223_v38 = vor.u32 %v4334_v33, %v3222_v30  ;;  %v3214_v39 = vld [vmem:[%s6727_s1] sm:$0xf] }
  0x60   : > { %797 = vmatpush.bf16.msrb.mxu3 %v3287_v23  ;;  %v4339_v40 = vld [vmem:[%s6727_s1 + $0x44] sm:$0xf]  ;;  %v3248_v41 = vld [vmem:[%s6727_s1 + $0x48] sm:$0xf0]  ;;  %v3291_v42 = vor.u32 %v4349_v35, %v3288_v36  ;;  %v4332_v43 = vld [vmem:[%s6727_s1 + $0x4] sm:$0xf0] }
  0x61   : > { %559 = vmatpush.bf16.msra.mxu0 %v3099_v5  ;;  %v4347_v44 = vld [vmem:[%s6727_s1 + $0x84] sm:$0xf]  ;;  %v3280_v45 = vld [vmem:[%s6727_s1 + $0x88] sm:$0xf0]  ;;  %v3414_v46 = vld [vmem:[%s6727_s1 + $0x1f0] sm:$0xf]  ;;  %v3251_v48 = vor.u32 %v4339_v40, %v3248_v41  ;;  %v3215_v52 = vor.u32 %v4332_v43, %v3214_v39 }
  0x62   : > { %775 = vmatpush.bf16.msrb.mxu1 %v3247_v61  ;;  %v4402_v47 = vld [vmem:[%s6727_s1 + $0x1f4] sm:$0xf0]  ;;  %v4337_v49 = vld [vmem:[%s6727_s1 + $0x34] sm:$0xf]  ;;  %v3448_v51 = vld [vmem:[%s6727_s1 + $0x238] sm:$0xf0]  ;;  %v3283_v55 = vor.u32 %v4347_v44, %v3280_v45 }
  0x63   : > { %597 = vmatpush.bf16.msra.mxu2 %v3103_v9  ;;  %v4409_v50 = vld [vmem:[%s6727_s1 + $0x234] sm:$0xf]  ;;  %v3090_v53 = vld [vmem:[%s4980_s10 + $0x30] sm:$0xf]  ;;  %v3240_v54 = vld [vmem:[%s6727_s1 + $0x38] sm:$0xf0]  ;;  %v3415_v60 = vor.u32 %v4402_v47, %v3414_v46 }
  0x64   : > { %560 = vmatmul.bf16.vlgmr.msra.gmra.mxu0 %v3083_v19  ;;  %798 = vmatpush.bf16.msrb.mxu3 %v3279_v34  ;;  %v3446_v56 = vld [vmem:[%s6727_s1 + $0x230] sm:$0xf]  ;;  %v4410_v57 = vld [vmem:[%s6727_s1 + $0x234] sm:$0xf0]  ;;  %v3198_v59 = vld [vmem:[%s4980_s10] sm:$0xf]  ;;  %v3451_v62 = vor.u32 %v4409_v50, %v3448_v51  ;;  %v3243_v6 = vor.u32 %v4337_v49, %v3240_v54 }
  0x65   : > { %810 = vmatpush.bf16.msrb.mxu0 %v3275_v12  ;;  %3193 = vmatmul.msk.bf16.gmra.mxu1 %vm545_vm0, %v3095_v24  ;;  %v4358_v58 = vld [vmem:[%s4980_s10 + $0x34] sm:$0xf0]  ;;  %v3406_v61 = vld [vmem:[%s6727_s1 + $0x1e0] sm:$0xf]  ;;  %v3447_v63 = vor.u32 %v4410_v57, %v3446_v56  ;;  %v4400_v0 = vld [vmem:[%s6727_s1 + $0x1e4] sm:$0xf0] }
  0x66   : > { %776 = vmatpush.bf16.msrb.mxu1 %v3239_v15  ;;  %598 = vmatmul.bf16.vlgmr.msra.gmra.mxu2 %v3083_v19  ;;  %v3438_v1 = vld [vmem:[%s6727_s1 + $0x220] sm:$0xf]  ;;  %v4408_v2 = vld [vmem:[%s6727_s1 + $0x224] sm:$0xf0]  ;;  %v4327_v4 = vld [vmem:[%s4980_s10 + $0x4] sm:$0xf]  ;;  %v3091_v11 = vor.u32 %v4358_v58, %v3090_v53  ;;  %v3407_v12 = vor.u32 %v4400_v0, %v3406_v61 }
  0x67   : > { %833 = vmatpush.bf16.msrb.mxu2 %v3307_v14  ;;  %3195 = vmatmul.msk.bf16.gmra.mxu3 %vm545_vm0, %v3095_v24  ;;  %v4328_v3 = vld [vmem:[%s4980_s10 + $0x4] sm:$0xf0]  ;;  %v3200_v5 = vld [vmem:[%s4980_s10 + $0x8] sm:$0xf0]  ;;  %v3439_v7 = vor.u32 %v4408_v2, %v3438_v1  ;;  %v4335_v8 = vld [vmem:[%s6727_s1 + $0x24] sm:$0xf] }
  0x68   : > { %1073 = vmatpush.bf16.msra.mxu3 %v3447_v63  ;;  %v3232_v9 = vld [vmem:[%s6727_s1 + $0x28] sm:$0xf0]  ;;  %v4407_v10 = vld [vmem:[%s6727_s1 + $0x224] sm:$0xf]  ;;  %v3430_v14 = vld [vmem:[%s6727_s1 + $0x210] sm:$0xf]  ;;  %v5202_v16 = vor.u32 %v4328_v3, %v3198_v59  ;;  %v5210_v19 = vor.u32 %v4327_v4, %v3200_v5 }
  0x69   : > { %811 = vmatpush.bf16.msrb.mxu0 %v3267_v27  ;;  %v3440_v13 = vld [vmem:[%s6727_s1 + $0x228] sm:$0xf0]  ;;  %v4406_v15 = vld [vmem:[%s6727_s1 + $0x214] sm:$0xf0]  ;;  %v3398_v17 = vld [vmem:[%s6727_s1 + $0x1d0] sm:$0xf]  ;;  %v3235_v20 = vor.u32 %v4335_v8, %v3232_v9 }
  0x6a   : > { %777 = vmatpush.bf16.msrb.mxu1 %v3231_v28  ;;  %v4398_v18 = vld [vmem:[%s6727_s1 + $0x1d4] sm:$0xf0]  ;;  %v4333_v21 = vld [vmem:[%s6727_s1 + $0x14] sm:$0xf]  ;;  %v3224_v22 = vld [vmem:[%s6727_s1 + $0x18] sm:$0xf0]  ;;  %v3443_v23 = vor.u32 %v4407_v10, %v3440_v13  ;;  %v3431_v24 = vor.u32 %v4406_v15, %v3430_v14 }
  0x6b   : > { %834 = vmatpush.bf16.msrb.mxu2 %v3299_v29  ;;  %v3399_v25 = vor.u32 %v4398_v18, %v3398_v17  ;;  %v3422_v26 = vld [vmem:[%s6727_s1 + $0x200] sm:$0xf]  ;;  %v4404_v27 = vld [vmem:[%s6727_s1 + $0x204] sm:$0xf0]  ;;  %v3227_v30 = vor.u32 %v4333_v21, %v3224_v22  ;;  %v4405_v31 = vld [vmem:[%s6727_s1 + $0x214] sm:$0xf] }
  0x6c   : > { %1074 = vmatpush.bf16.msra.mxu3 %v3439_v7  ;;  %v3390_v28 = vld [vmem:[%s6727_s1 + $0x1c0] sm:$0xf]  ;;  %v4396_v29 = vld [vmem:[%s6727_s1 + $0x1c4] sm:$0xf0]  ;;  %v3432_v32 = vld [vmem:[%s6727_s1 + $0x218] sm:$0xf0]  ;;  %v3423_v35 = vor.u32 %v4404_v27, %v3422_v26 }
  0x6d   : > { %812 = vmatpush.bf16.msrb.mxu0 %v3259_v37  ;;  %v4331_v33 = vld [vmem:[%s6727_s1 + $0x4] sm:$0xf]  ;;  %v3216_v34 = vld [vmem:[%s6727_s1 + $0x8] sm:$0xf0]  ;;  %v3435_v36 = vor.u32 %v4405_v31, %v3432_v32  ;;  %v4401_v37 = vld [vmem:[%s6727_s1 + $0x1f4] sm:$0xf]  ;;  %v3391_v39 = vor.u32 %v4396_v29, %v3390_v28 }
  0x6e   : > { %778 = vmatpush.bf16.msrb.mxu1 %v3223_v38  ;;  %v3416_v38 = vld [vmem:[%s6727_s1 + $0x1f8] sm:$0xf0]  ;;  %v3382_v40 = vld [vmem:[%s6727_s1 + $0x1b0] sm:$0xf]  ;;  %v4394_v41 = vld [vmem:[%s6727_s1 + $0x1b4] sm:$0xf0]  ;;  %v3219_v44 = vor.u32 %v4331_v33, %v3216_v34 }
  0x6f   : > { %835 = vmatpush.bf16.msrb.mxu2 %v3291_v42  ;;  %v4403_v42 = vld [vmem:[%s6727_s1 + $0x204] sm:$0xf]  ;;  %v3424_v43 = vld [vmem:[%s6727_s1 + $0x208] sm:$0xf0]  ;;  %v3419_v45 = vor.u32 %v4401_v37, %v3416_v38  ;;  %v3383_v49 = vor.u32 %v4394_v41, %v3382_v40  ;;  %v3374_v50 = vld [vmem:[%s6727_s1 + $0x1a0] sm:$0xf] }
  0x70   : > { %1075 = vmatpush.bf16.msra.mxu3 %v3431_v24  ;;  %v3427_v46 = vor.u32 %v4403_v42, %v3424_v43  ;;  %v4399_v47 = vld [vmem:[%s6727_s1 + $0x1e4] sm:$0xf]  ;;  %v4392_v51 = vld [vmem:[%s6727_s1 + $0x1a4] sm:$0xf0]  ;;  %v4330_v53 = vld [vmem:[%s4980_s10 + $0x14] sm:$0xf0] }
  0x71   : > { %813 = vmatpush.bf16.msrb.mxu0 %v3251_v48  ;;  %v3408_v48 = vld [vmem:[%s6727_s1 + $0x1e8] sm:$0xf0]  ;;  %v4329_v54 = vld [vmem:[%s4980_s10 + $0x14] sm:$0xf]  ;;  %v3400_v58 = vld [vmem:[%s6727_s1 + $0x1d8] sm:$0xf0]  ;;  %v3375_v59 = vor.u32 %v4392_v51, %v3374_v50 }
  0x72   : > { %779 = vmatpush.bf16.msrb.mxu1 %v3215_v52  ;;  %v3206_v52 = vld [vmem:[%s4980_s10 + $0x10] sm:$0xf]  ;;  %v3411_v56 = vor.u32 %v4399_v47, %v3408_v48  ;;  %v4397_v57 = vld [vmem:[%s6727_s1 + $0x1d4] sm:$0xf]  ;;  %v4395_v1 = vld [vmem:[%s6727_s1 + $0x1c4] sm:$0xf] }
  0x73   : > { %836 = vmatpush.bf16.msrb.mxu2 %v3283_v55  ;;  %v3208_v55 = vld [vmem:[%s4980_s10 + $0x18] sm:$0xf0]  ;;  %v3366_v61 = vld [vmem:[%s6727_s1 + $0x190] sm:$0xf]  ;;  %v3403_v0 = vor.u32 %v4397_v57, %v3400_v58  ;;  %v3392_v2 = vld [vmem:[%s6727_s1 + $0x1c8] sm:$0xf0] }
  0x74   : > { %565 = vmatmul.bf16.gmra.mxu0 %v3091_v11  ;;  %1076 = vmatpush.bf16.msra.mxu3 %v3423_v35  ;;  %v5293_v63 = vor.u32 %v4329_v54, %v3208_v55  ;;  %v3590_v4 = vld [vmem:[%s6727_s1 + $0x2f0] sm:$0xf]  ;;  %v4438_v5 = vld [vmem:[%s6727_s1 + $0x2f4] sm:$0xf0]  ;;  %v4388_v7 = vld [vmem:[%s6727_s1 + $0x184] sm:$0xf0]  ;;  %v3395_v13 = vor.u32 %v4395_v1, %v3392_v2 }
  0x75   : > { %814 = vmatpush.bf16.msrb.mxu0 %v3243_v6  ;;  %780 = vmatmul.bf16.vlgmr.msrb.gmra.mxu1 %v5202_v16  ;;  %v3358_v6 = vld [vmem:[%s6727_s1 + $0x180] sm:$0xf]  ;;  %v3558_v8 = vld [vmem:[%s6727_s1 + $0x2b0] sm:$0xf]  ;;  %v3591_v9 = vor.u32 %v4438_v5, %v3590_v4  ;;  %v4430_v10 = vld [vmem:[%s6727_s1 + $0x2b4] sm:$0xf0] }
  0x76   : > { %1050 = vmatpush.bf16.msra.mxu1 %v3415_v60  ;;  %603 = vmatmul.bf16.gmra.mxu2 %v3091_v11  ;;  %v5285_v60 = vor.u32 %v4330_v53, %v3206_v52  ;;  %v4437_v11 = vld [vmem:[%s6727_s1 + $0x2f4] sm:$0xf]  ;;  %v3582_v15 = vld [vmem:[%s6727_s1 + $0x2e0] sm:$0xf]  ;;  %v3384_v18 = vld [vmem:[%s6727_s1 + $0x1b8] sm:$0xf0]  ;;  %v3559_v21 = vor.u32 %v4430_v10, %v3558_v8 }
  0x77   : > { %1111 = vmatpush.bf16.msra.mxu2 %v3451_v62  ;;  %3308 = vmatmul.msk.bf16.vlgmr.msrb.gmra.mxu3 %vm545_vm0, %v5210_v19  ;;  %v4390_v62 = vld [vmem:[%s6727_s1 + $0x194] sm:$0xf0]  ;;  %v4393_v17 = vld [vmem:[%s6727_s1 + $0x1b4] sm:$0xf]  ;;  %v3550_v22 = vld [vmem:[%s6727_s1 + $0x2a0] sm:$0xf] }
  0x78   : > { %v3367_v3 = vor.u32 %v4390_v62, %v3366_v61  ;;  %1359 = vmatpush.bf16.msrb.mxu3 %v3591_v9  ;;  %v4435_v24 = vld [vmem:[%s6727_s1 + $0x2e4] sm:$0xf]  ;;  %v3574_v26 = vld [vmem:[%s6727_s1 + $0x2d0] sm:$0xf]  ;;  %v3387_v27 = vor.u32 %v4393_v17, %v3384_v18  ;;  %v4434_v29 = vld [vmem:[%s6727_s1 + $0x2d4] sm:$0xf0] }
  0x79   : > { %815 = vmatpush.bf16.msrb.mxu0 %v3235_v20  ;;  %v3376_v31 = vld [vmem:[%s6727_s1 + $0x1a8] sm:$0xf0]  ;;  %v3575_v32 = vor.u32 %v4434_v29, %v3574_v26  ;;  %v3566_v33 = vld [vmem:[%s6727_s1 + $0x2c0] sm:$0xf]  ;;  %v4432_v35 = vld [vmem:[%s6727_s1 + $0x2c4] sm:$0xf0] }
  0x7a   : > { %1051 = vmatpush.bf16.msra.mxu1 %v3407_v12  ;;  %v3592_v12 = vld [vmem:[%s6727_s1 + $0x2f8] sm:$0xf0]  ;;  %v3342_v37 = vld [vmem:[%s4980_s10 + $0x40] sm:$0xf]  ;;  %v4384_v38 = vld [vmem:[%s4980_s10 + $0x44] sm:$0xf0]  ;;  %v3567_v43 = vor.u32 %v4432_v35, %v3566_v33 }
  0x7b   : > { %1112 = vmatpush.bf16.msra.mxu2 %v3443_v23  ;;  %v3595_v14 = vor.u32 %v4437_v11, %v3592_v12  ;;  %v4428_v23 = vld [vmem:[%s6727_s1 + $0x2a4] sm:$0xf0]  ;;  %v3542_v41 = vld [vmem:[%s6727_s1 + $0x290] sm:$0xf]  ;;  %v4426_v42 = vld [vmem:[%s6727_s1 + $0x294] sm:$0xf0] }
  0x7c   : > { %v3551_v34 = vor.u32 %v4428_v23, %v3550_v22  ;;  %v3543_v48 = vor.u32 %v4426_v42, %v3542_v41  ;;  %v3534_v50 = vld [vmem:[%s6727_s1 + $0x280] sm:$0xf]  ;;  %v4424_v51 = vld [vmem:[%s6727_s1 + $0x284] sm:$0xf0]  ;;  %v4387_v52 = vld [vmem:[%s6727_s1 + $0x184] sm:$0xf] }
  0x7d   : > { %816 = vmatpush.bf16.msrb.mxu0 %v3227_v30  ;;  %v4391_v30 = vld [vmem:[%s6727_s1 + $0x1a4] sm:$0xf]  ;;  %v3360_v53 = vld [vmem:[%s6727_s1 + $0x188] sm:$0xf0]  ;;  %v4429_v54 = vld [vmem:[%s6727_s1 + $0x2b4] sm:$0xf] }
  0x7e   : > { %1052 = vmatpush.bf16.msra.mxu1 %v3399_v25  ;;  %v3584_v25 = vld [vmem:[%s6727_s1 + $0x2e8] sm:$0xf0]  ;;  %v3379_v40 = vor.u32 %v4391_v30, %v3376_v31  ;;  %v3560_v55 = vld [vmem:[%s6727_s1 + $0x2b8] sm:$0xf0]  ;;  %v4433_v57 = vld [vmem:[%s6727_s1 + $0x2d4] sm:$0xf] }
  0x7f   : > { %1113 = vmatpush.bf16.msra.mxu2 %v3435_v36  ;;  %v3587_v28 = vor.u32 %v4435_v24, %v3584_v25  ;;  %v4383_v36 = vld [vmem:[%s4980_s10 + $0x44] sm:$0xf]  ;;  %v3576_v58 = vld [vmem:[%s6727_s1 + $0x2d8] sm:$0xf0]  ;;  %v4422_v61 = vld [vmem:[%s6727_s1 + $0x274] sm:$0xf0] }
  0x80   : > { %v3579_v62 = vor.u32 %v4433_v57, %v3576_v58  ;;  %v3552_v1 = vld [vmem:[%s6727_s1 + $0x2a8] sm:$0xf0]  ;;  %v4431_v2 = vld [vmem:[%s6727_s1 + $0x2c4] sm:$0xf]  ;;  %v4385_v9 = vld [vmem:[%s4980_s10 + $0x54] sm:$0xf] }
  0x81   : > { %817 = vmatpush.bf16.msrb.mxu0 %v3219_v44  ;;  %v4389_v44 = vld [vmem:[%s6727_s1 + $0x194] sm:$0xf]  ;;  %v3350_v10 = vld [vmem:[%s4980_s10 + $0x50] sm:$0xf]  ;;  %v4386_v11 = vld [vmem:[%s4980_s10 + $0x54] sm:$0xf0] }
  0x82   : > { %1053 = vmatpush.bf16.msra.mxu1 %v3391_v39  ;;  %v3344_v39 = vld [vmem:[%s4980_s10 + $0x48] sm:$0xf0]  ;;  %v4418_v17 = vld [vmem:[%s6727_s1 + $0x254] sm:$0xf0]  ;;  %v5457_v18 = vor.u32 %v4386_v11, %v3350_v10  ;;  %v3502_v24 = vld [vmem:[%s6727_s1 + $0x240] sm:$0xf] }
  0x83   : > { %1114 = vmatpush.bf16.msra.mxu2 %v3427_v46  ;;  %v3343_v46 = vor.u32 %v4384_v38, %v3342_v37  ;;  %v3347_v47 = vor.u32 %v4383_v36, %v3344_v39  ;;  %v3536_v22 = vld [vmem:[%s6727_s1 + $0x288] sm:$0xf0]  ;;  %v4416_v25 = vld [vmem:[%s6727_s1 + $0x244] sm:$0xf0]  ;;  %v3734_v26 = vld [vmem:[%s6727_s1 + $0x3b0] sm:$0xf] }
  0x84   : > { %818 = vmatmul.bf16.vlgmr.msrb.gmra.mxu0 %v5202_v16  ;;  %v4436_v16 = vld [vmem:[%s6727_s1 + $0x2e4] sm:$0xf0]  ;;  %v4458_v29 = vld [vmem:[%s6727_s1 + $0x374] sm:$0xf0]  ;;  %v4465_v33 = vld [vmem:[%s6727_s1 + $0x3b4] sm:$0xf]  ;;  %v3503_v36 = vor.u32 %v4416_v25, %v3502_v24 }
  0x85   : > { %1088 = vmatpush.bf16.msra.mxu0 %v3419_v45  ;;  %785 = vmatmul.bf16.gmra.mxu1 %v5285_v60  ;;  %v3583_v20 = vor.u32 %v4436_v16, %v3582_v15  ;;  %v3368_v45 = vld [vmem:[%s6727_s1 + $0x198] sm:$0xf0]  ;;  %v3510_v16 = vld [vmem:[%s6727_s1 + $0x250] sm:$0xf]  ;;  %v3726_v38 = vld [vmem:[%s6727_s1 + $0x3a0] sm:$0xf] }
  0x86   : > { %1054 = vmatpush.bf16.msra.mxu1 %v3383_v49  ;;  %3310 = vmatmul.msk.bf16.vlgmr.msrb.gmra.mxu2 %vm545_vm0, %v5210_v19  ;;  %v3359_v19 = vor.u32 %v4388_v7, %v3358_v6  ;;  %v3371_v49 = vor.u32 %v4389_v44, %v3368_v45  ;;  %v3518_v6 = vld [vmem:[%s6727_s1 + $0x260] sm:$0xf]  ;;  %v4420_v7 = vld [vmem:[%s6727_s1 + $0x264] sm:$0xf0]  ;;  %v3544_v15 = vld [vmem:[%s6727_s1 + $0x298] sm:$0xf0]  ;;  %v3511_v23 = vor.u32 %v4418_v17, %v3510_v16 }
  0x87   : > { %3309 = vmatmul.msk.bf16.gmra.mxu3 %vm545_vm0, %v5293_v63  ;;  %1397 = vmatpush.bf16.msrb.mxu2 %v3595_v14  ;;  %v3519_v12 = vor.u32 %v4420_v7, %v3518_v6  ;;  %v4425_v14 = vld [vmem:[%s6727_s1 + $0x294] sm:$0xf]  ;;  %v3528_v35 = vld [vmem:[%s6727_s1 + $0x278] sm:$0xf0]  ;;  %v4464_v39 = vld [vmem:[%s6727_s1 + $0x3a4] sm:$0xf0] }
  0x88   : > { %1360 = vmatpush.bf16.msrb.mxu3 %v3583_v20  ;;  %v3547_v20 = vor.u32 %v4425_v14, %v3544_v15  ;;  %v3727_v41 = vor.u32 %v4464_v39, %v3726_v38  ;;  %v3694_v42 = vld [vmem:[%s6727_s1 + $0x360] sm:$0xf]  ;;  %v4463_v45 = vld [vmem:[%s6727_s1 + $0x3a4] sm:$0xf]  ;;  %v4457_v10 = vld [vmem:[%s6727_s1 + $0x374] sm:$0xf] }
  0x89   : > { %1089 = vmatpush.bf16.msra.mxu0 %v3411_v56  ;;  %v3535_v56 = vor.u32 %v4424_v51, %v3534_v50  ;;  %v4462_v51 = vld [vmem:[%s6727_s1 + $0x394] sm:$0xf0]  ;;  %v3486_v58 = vld [vmem:[%s4980_s10 + $0x60] sm:$0xf]  ;;  %v3704_v11 = vld [vmem:[%s6727_s1 + $0x378] sm:$0xf0] }
  0x8a   : > { %1055 = vmatpush.bf16.msra.mxu1 %v3375_v59  ;;  %v3363_v59 = vor.u32 %v4387_v52, %v3360_v53  ;;  %v4450_v14 = vld [vmem:[%s6727_s1 + $0x334] sm:$0xf0]  ;;  %v4461_v16 = vld [vmem:[%s6727_s1 + $0x394] sm:$0xf]  ;;  %v3720_v17 = vld [vmem:[%s6727_s1 + $0x398] sm:$0xf0] }
  0x8b   : > { %1398 = vmatpush.bf16.msrb.mxu2 %v3587_v28  ;;  %v3702_v28 = vld [vmem:[%s6727_s1 + $0x370] sm:$0xf]  ;;  %v4448_v24 = vld [vmem:[%s6727_s1 + $0x324] sm:$0xf0]  ;;  %v4459_v25 = vld [vmem:[%s6727_s1 + $0x384] sm:$0xf] }
  0x8c   : > { %1361 = vmatpush.bf16.msrb.mxu3 %v3575_v32  ;;  %v4421_v32 = vld [vmem:[%s6727_s1 + $0x274] sm:$0xf]  ;;  %v4451_v39 = vld [vmem:[%s6727_s1 + $0x344] sm:$0xf] }
  0x8d   : > { %1090 = vmatpush.bf16.msra.mxu0 %v3403_v0  ;;  %v4427_v0 = vld [vmem:[%s6727_s1 + $0x2a4] sm:$0xf]  ;;  %v3531_v44 = vor.u32 %v4421_v32, %v3528_v35  ;;  %v3654_v32 = vld [vmem:[%s6727_s1 + $0x310] sm:$0xf]  ;;  %v4414_v35 = vld [vmem:[%s4980_s10 + $0x74] sm:$0xf0] }
  0x8e   : > { %1056 = vmatpush.bf16.msra.mxu1 %v3367_v3  ;;  %v3568_v3 = vld [vmem:[%s6727_s1 + $0x2c8] sm:$0xf0]  ;;  %v3555_v8 = vor.u32 %v4427_v0, %v3552_v1  ;;  %v3710_v0 = vld [vmem:[%s6727_s1 + $0x380] sm:$0xf]  ;;  %v4460_v1 = vld [vmem:[%s6727_s1 + $0x384] sm:$0xf0] }
  0x8f   : > { %1399 = vmatpush.bf16.msrb.mxu2 %v3579_v62  ;;  %v3571_v5 = vor.u32 %v4431_v2, %v3568_v3  ;;  %v3512_v62 = vld [vmem:[%s6727_s1 + $0x258] sm:$0xf0]  ;;  %v3678_v3 = vld [vmem:[%s6727_s1 + $0x340] sm:$0xf] }
  0x90   : > { %1362 = vmatpush.bf16.msrb.mxu3 %v3567_v43  ;;  %v4456_v43 = vld [vmem:[%s6727_s1 + $0x364] sm:$0xf0] }
  0x91   : > { %1091 = vmatpush.bf16.msra.mxu0 %v3395_v13  ;;  %v3352_v13 = vld [vmem:[%s4980_s10 + $0x58] sm:$0xf0]  ;;  %v3695_v52 = vor.u32 %v4456_v43, %v3694_v42  ;;  %v3646_v43 = vld [vmem:[%s6727_s1 + $0x300] sm:$0xf] }
  0x92   : > { %1057 = vmatpush.bf16.msra.mxu1 %v3359_v19  ;;  %v5459_v19 = vor.u32 %v4385_v9, %v3352_v13  ;;  %v3504_v9 = vld [vmem:[%s6727_s1 + $0x248] sm:$0xf0]  ;;  %v3670_v13 = vld [vmem:[%s6727_s1 + $0x330] sm:$0xf] }
  0x93   : > { %1400 = vmatpush.bf16.msrb.mxu2 %v3571_v5  ;;  %v3711_v5 = vor.u32 %v4460_v1, %v3710_v0  ;;  %v3870_v0 = vld [vmem:[%s6727_s1 + $0x460] sm:$0xf]  ;;  %v4492_v1 = vld [vmem:[%s6727_s1 + $0x464] sm:$0xf0] }
  0x94   : > { %823 = vmatmul.bf16.gmra.mxu0 %v5285_v60  ;;  %v3526_v60 = vld [vmem:[%s6727_s1 + $0x270] sm:$0xf] }
  0x95   : > { %1092 = vmatpush.bf16.msra.mxu0 %v3387_v27  ;;  %1058 = vmatmul.bf16.vlgmr.msra.gmra.mxu1 %v3343_v46  ;;  %v3527_v4 = vor.u32 %v4422_v61, %v3526_v60  ;;  %v4466_v27 = vld [vmem:[%s6727_s1 + $0x3b4] sm:$0xf0]  ;;  %v3488_v60 = vld [vmem:[%s4980_s10 + $0x68] sm:$0xf0]  ;;  %v4417_v61 = vld [vmem:[%s6727_s1 + $0x254] sm:$0xf] }
  0x96   : > { %1336 = vmatpush.bf16.msrb.mxu1 %v3559_v21  ;;  %3311 = vmatmul.msk.bf16.gmra.mxu2 %vm545_vm0, %v5293_v63  ;;  %v3563_v63 = vor.u32 %v4429_v54, %v3560_v55  ;;  %v4423_v21 = vld [vmem:[%s6727_s1 + $0x284] sm:$0xf]  ;;  %v3735_v30 = vor.u32 %v4466_v27, %v3734_v26  ;;  %v3686_v54 = vld [vmem:[%s6727_s1 + $0x350] sm:$0xf]  ;;  %v4454_v55 = vld [vmem:[%s6727_s1 + $0x354] sm:$0xf0]  ;;  %v3515_v7 = vor.u32 %v4417_v61, %v3512_v62 }
  0x97   : > { %3452 = vmatmul.msk.bf16.vlgmr.msra.gmra.mxu3 %vm545_vm0, %v3347_v47  ;;  %v3539_v31 = vor.u32 %v4423_v21, %v3536_v22  ;;  %v3696_v21 = vld [vmem:[%s6727_s1 + $0x368] sm:$0xf0]  ;;  %v3671_v22 = vor.u32 %v4450_v14, %v3670_v13  ;;  %v4447_v61 = vld [vmem:[%s6727_s1 + $0x324] sm:$0xf] }
  0x98   : > { %1645 = vmatpush.bf16.msra.mxu3 %v3735_v30  ;;  %v3712_v27 = vld [vmem:[%s6727_s1 + $0x388] sm:$0xf0] }
  0x99   : > { %1093 = vmatpush.bf16.msra.mxu0 %v3379_v40  ;;  %v3703_v40 = vor.u32 %v4458_v29, %v3702_v28  ;;  %v4453_v28 = vld [vmem:[%s6727_s1 + $0x354] sm:$0xf]  ;;  %v3688_v29 = vld [vmem:[%s6727_s1 + $0x358] sm:$0xf0] }
  0x9a   : > { %1337 = vmatpush.bf16.msrb.mxu1 %v3551_v34  ;;  %v3736_v34 = vld [vmem:[%s6727_s1 + $0x3b8] sm:$0xf0]  ;;  %v3691_v38 = vor.u32 %v4453_v28, %v3688_v29  ;;  %v4485_v28 = vld [vmem:[%s6727_s1 + $0x434] sm:$0xf] }
  0x9b   : > { %v3739_v37 = vor.u32 %v4465_v33, %v3736_v34  ;;  %v4446_v33 = vld [vmem:[%s6727_s1 + $0x314] sm:$0xf0]  ;;  %v3494_v34 = vld [vmem:[%s4980_s10 + $0x70] sm:$0xf]  ;;  %v3848_v29 = vld [vmem:[%s6727_s1 + $0x438] sm:$0xf0] }
  0x9c   : > { %1646 = vmatpush.bf16.msra.mxu3 %v3727_v41  ;;  %v3655_v41 = vor.u32 %v4446_v33, %v3654_v32  ;;  %v5633_v42 = vor.u32 %v4414_v35, %v3494_v34  ;;  %v3814_v35 = vld [vmem:[%s6727_s1 + $0x3f0] sm:$0xf] }
  0x9d   : > { %1094 = vmatpush.bf16.msra.mxu0 %v3371_v49  ;;  %v3520_v49 = vld [vmem:[%s6727_s1 + $0x268] sm:$0xf0] }
  0x9e   : > { %1338 = vmatpush.bf16.msrb.mxu1 %v3543_v48  ;;  %v4419_v48 = vld [vmem:[%s6727_s1 + $0x264] sm:$0xf] }
  0x9f   : > { %v3523_v57 = vor.u32 %v4419_v48, %v3520_v49  ;;  %v4449_v49 = vld [vmem:[%s6727_s1 + $0x334] sm:$0xf] }
  0xa1   : > { %1095 = vmatpush.bf16.msra.mxu0 %v3363_v59  ;;  %v4412_v59 = vld [vmem:[%s4980_s10 + $0x64] sm:$0xf0] }
  0xa2   : > { %1339 = vmatpush.bf16.msrb.mxu1 %v3535_v56  ;;  %v4411_v56 = vld [vmem:[%s4980_s10 + $0x64] sm:$0xf]  ;;  %v5553_v2 = vor.u32 %v4412_v59, %v3486_v58  ;;  %v4493_v58 = vld [vmem:[%s6727_s1 + $0x474] sm:$0xf]  ;;  %v3880_v59 = vld [vmem:[%s6727_s1 + $0x478] sm:$0xf0] }
  0xa3   : > { %v5561_v6 = vor.u32 %v4411_v56, %v3488_v60  ;;  %v3883_v62 = vor.u32 %v4493_v58, %v3880_v59  ;;  %v4441_v58 = vld [vmem:[%s4980_s10 + $0x94] sm:$0xf]  ;;  %v3638_v59 = vld [vmem:[%s4980_s10 + $0x90] sm:$0xf] }
  0xa4   : > { %1096 = vmatmul.bf16.vlgmr.msra.gmra.mxu0 %v3343_v46  ;;  %v3728_v46 = vld [vmem:[%s6727_s1 + $0x3a8] sm:$0xf0] }
  0xa5   : > { %1374 = vmatpush.bf16.msrb.mxu0 %v3563_v63  ;;  %1063 = vmatmul.bf16.gmra.mxu1 %v5457_v18  ;;  %v3731_v50 = vor.u32 %v4463_v45, %v3728_v46  ;;  %v3687_v63 = vor.u32 %v4454_v55, %v3686_v54  ;;  %v3846_v46 = vld [vmem:[%s6727_s1 + $0x430] sm:$0xf]  ;;  %v3838_v55 = vld [vmem:[%s6727_s1 + $0x420] sm:$0xf] }
  0xa6   : > { %1340 = vmatpush.bf16.msrb.mxu1 %v3527_v4  ;;  %3454 = vmatmul.msk.bf16.vlgmr.msra.gmra.mxu2 %vm545_vm0, %v3347_v47  ;;  %v3718_v47 = vld [vmem:[%s6727_s1 + $0x390] sm:$0xf]  ;;  %v4452_v4 = vld [vmem:[%s6727_s1 + $0x344] sm:$0xf0] }
  0xa7   : > { %3453 = vmatmul.msk.bf16.gmra.mxu3 %vm545_vm0, %v5459_v19  ;;  %1683 = vmatpush.bf16.msra.mxu2 %v3739_v37  ;;  %v3719_v53 = vor.u32 %v4462_v51, %v3718_v47  ;;  %v3496_v37 = vld [vmem:[%s4980_s10 + $0x78] sm:$0xf0]  ;;  %v4486_v47 = vld [vmem:[%s6727_s1 + $0x434] sm:$0xf0] }
  0xa8   : > { %v3847_v54 = vor.u32 %v4486_v47, %v3846_v46 }
  0xa9   : > { %1375 = vmatpush.bf16.msrb.mxu0 %v3555_v8  ;;  %1647 = vmatpush.bf16.msra.mxu3 %v3719_v53  ;;  %v4415_v8 = vld [vmem:[%s6727_s1 + $0x244] sm:$0xf]  ;;  %v4494_v53 = vld [vmem:[%s6727_s1 + $0x474] sm:$0xf0] }
  0xaa   : > { %1341 = vmatpush.bf16.msrb.mxu1 %v3519_v12  ;;  %v3679_v12 = vor.u32 %v4452_v4, %v3678_v3  ;;  %v3507_v15 = vor.u32 %v4415_v8, %v3504_v9  ;;  %v3871_v3 = vor.u32 %v4492_v1, %v3870_v0  ;;  %v3830_v4 = vld [vmem:[%s6727_s1 + $0x410] sm:$0xf]  ;;  %v3872_v8 = vld [vmem:[%s6727_s1 + $0x468] sm:$0xf0]  ;;  %v3790_v1 = vld [vmem:[%s6727_s1 + $0x3c0] sm:$0xf] }
  0xab   : > { %1684 = vmatpush.bf16.msra.mxu2 %v3731_v50  ;;  %v3672_v50 = vld [vmem:[%s6727_s1 + $0x338] sm:$0xf0]  ;;  %v3862_v9 = vld [vmem:[%s6727_s1 + $0x450] sm:$0xf]  ;;  %v3824_v0 = vld [vmem:[%s6727_s1 + $0x408] sm:$0xf0] }
  0xac   : > { %v3675_v60 = vor.u32 %v4449_v49, %v3672_v50  ;;  %v3832_v49 = vld [vmem:[%s6727_s1 + $0x418] sm:$0xf0] }
  0xad   : > { %1376 = vmatpush.bf16.msrb.mxu0 %v3547_v20  ;;  %1648 = vmatpush.bf16.msra.mxu3 %v3711_v5  ;;  %v4455_v20 = vld [vmem:[%s6727_s1 + $0x364] sm:$0xf]  ;;  %v4482_v5 = vld [vmem:[%s6727_s1 + $0x414] sm:$0xf0] }
  0xae   : > { %1342 = vmatpush.bf16.msrb.mxu1 %v3511_v23  ;;  %v3662_v23 = vld [vmem:[%s6727_s1 + $0x320] sm:$0xf]  ;;  %v3699_v26 = vor.u32 %v4455_v20, %v3696_v21  ;;  %v4443_v21 = vld [vmem:[%s6727_s1 + $0x304] sm:$0xf] }
  0xaf   : > { %v3663_v30 = vor.u32 %v4448_v24, %v3662_v23  ;;  %v4480_v23 = vld [vmem:[%s6727_s1 + $0x404] sm:$0xf0]  ;;  %v3648_v24 = vld [vmem:[%s6727_s1 + $0x308] sm:$0xf0] }
  0xb0   : > { %v3651_v34 = vor.u32 %v4443_v21, %v3648_v24  ;;  %v4475_v24 = vld [vmem:[%s6727_s1 + $0x3e4] sm:$0xf] }
  0xb1   : > { %1377 = vmatpush.bf16.msrb.mxu0 %v3539_v31  ;;  %v3715_v31 = vor.u32 %v4459_v25, %v3712_v27  ;;  %v3854_v25 = vld [vmem:[%s6727_s1 + $0x440] sm:$0xf] }
  0xb2   : > { %1343 = vmatpush.bf16.msrb.mxu1 %v3503_v36  ;;  %v4413_v36 = vld [vmem:[%s4980_s10 + $0x74] sm:$0xf] }
  0xb3   : > { %v5641_v45 = vor.u32 %v4413_v36, %v3496_v37  ;;  %v4478_v36 = vld [vmem:[%s6727_s1 + $0x3f4] sm:$0xf0]  ;;  %v3851_v37 = vor.u32 %v4485_v28, %v3848_v29  ;;  %v4014_v29 = vld [vmem:[%s6727_s1 + $0x520] sm:$0xf] }
  0xb4   : > { %1101 = vmatmul.bf16.gmra.mxu0 %v5457_v18  ;;  %v3707_v18 = vor.u32 %v4457_v10, %v3704_v11  ;;  %v4490_v10 = vld [vmem:[%s6727_s1 + $0x454] sm:$0xf0]  ;;  %v4445_v11 = vld [vmem:[%s6727_s1 + $0x314] sm:$0xf] }
  0xb5   : > { %1378 = vmatpush.bf16.msrb.mxu0 %v3531_v44  ;;  %1344 = vmatmul.bf16.vlgmr.msrb.gmra.mxu1 %v5553_v2  ;;  %v4444_v44 = vld [vmem:[%s6727_s1 + $0x304] sm:$0xf0]  ;;  %v3863_v14 = vor.u32 %v4490_v10, %v3862_v9 }
  0xb6   : > { %1622 = vmatpush.bf16.msra.mxu1 %v3703_v40  ;;  %3455 = vmatmul.msk.bf16.gmra.mxu2 %vm545_vm0, %v5459_v19  ;;  %v3723_v19 = vor.u32 %v4461_v16, %v3720_v17  ;;  %v3680_v40 = vld [vmem:[%s6727_s1 + $0x348] sm:$0xf0]  ;;  %v3647_v51 = vor.u32 %v4444_v44, %v3646_v43  ;;  %v3831_v16 = vor.u32 %v4482_v5, %v3830_v4  ;;  %v3806_v43 = vld [vmem:[%s6727_s1 + $0x3e0] sm:$0xf]  ;;  %v4476_v44 = vld [vmem:[%s6727_s1 + $0x3e4] sm:$0xf0] }
  0xb7   : > { %3596 = vmatmul.msk.bf16.vlgmr.msrb.gmra.mxu3 %vm545_vm0, %v5561_v6  ;;  %v3683_v48 = vor.u32 %v4451_v39, %v3680_v40  ;;  %v3632_v17 = vld [vmem:[%s4980_s10 + $0x88] sm:$0xf0]  ;;  %v3815_v40 = vor.u32 %v4478_v36, %v3814_v35  ;;  %v4510_v35 = vld [vmem:[%s6727_s1 + $0x4d4] sm:$0xf0] }
  0xb8   : > { %1685 = vmatpush.bf16.msra.mxu2 %v3723_v19  ;;  %v4440_v19 = vld [vmem:[%s4980_s10 + $0x84] sm:$0xf0]  ;;  %v3840_v39 = vld [vmem:[%s6727_s1 + $0x428] sm:$0xf0] }
  0xb9   : > { %1379 = vmatpush.bf16.msrb.mxu0 %v3523_v57  ;;  %v4484_v57 = vld [vmem:[%s6727_s1 + $0x424] sm:$0xf0] }
  0xba   : > { %1623 = vmatpush.bf16.msra.mxu1 %v3695_v52  ;;  %v3878_v52 = vld [vmem:[%s6727_s1 + $0x470] sm:$0xf] }
  0xbb   : > { %v3879_v56 = vor.u32 %v4494_v53, %v3878_v52  ;;  %v3798_v52 = vld [vmem:[%s6727_s1 + $0x3d0] sm:$0xf]  ;;  %v4474_v53 = vld [vmem:[%s6727_s1 + $0x3d4] sm:$0xf0] }
  0xbc   : > { %1686 = vmatpush.bf16.msra.mxu2 %v3715_v31 }
  0xbd   : > { %1380 = vmatpush.bf16.msrb.mxu0 %v3515_v7  ;;  %1931 = vmatpush.bf16.msrb.mxu3 %v3879_v56 }
  0xbe   : > { %1624 = vmatpush.bf16.msra.mxu1 %v3687_v63  ;;  %v3664_v63 = vld [vmem:[%s6727_s1 + $0x328] sm:$0xf0] }
  0xbf   : > { %v3667_v7 = vor.u32 %v4447_v61, %v3664_v63  ;;  %v3799_v61 = vor.u32 %v4474_v53, %v3798_v52  ;;  %v4479_v63 = vld [vmem:[%s6727_s1 + $0x404] sm:$0xf]  ;;  %v3776_v52 = vld [vmem:[%s4980_s10 + $0xa8] sm:$0xf0]  ;;  %v3774_v53 = vld [vmem:[%s4980_s10 + $0xa0] sm:$0xf] }
  0xc1   : > { %1381 = vmatpush.bf16.msrb.mxu0 %v3507_v15  ;;  %1932 = vmatpush.bf16.msrb.mxu3 %v3871_v3  ;;  %v4439_v15 = vld [vmem:[%s4980_s10 + $0x84] sm:$0xf] }
  0xc2   : > { %1625 = vmatpush.bf16.msra.mxu1 %v3679_v12  ;;  %v3656_v12 = vld [vmem:[%s6727_s1 + $0x318] sm:$0xf0]  ;;  %v5745_v32 = vor.u32 %v4439_v15, %v3632_v17  ;;  %v4522_v17 = vld [vmem:[%s6727_s1 + $0x534] sm:$0xf0] }
  0xc3   : > { %v3659_v20 = vor.u32 %v4445_v11, %v3656_v12  ;;  %v3827_v11 = vor.u32 %v4479_v63, %v3824_v0  ;;  %v4477_v12 = vld [vmem:[%s6727_s1 + $0x3f4] sm:$0xf]  ;;  %v4516_v63 = vld [vmem:[%s6727_s1 + $0x504] sm:$0xf0] }
  0xc4   : > { %1382 = vmatmul.bf16.vlgmr.msrb.gmra.mxu0 %v5553_v2  ;;  %v3839_v2 = vor.u32 %v4484_v57, %v3838_v55  ;;  %v3856_v55 = vld [vmem:[%s6727_s1 + $0x448] sm:$0xf0] }
  0xc5   : > { %1660 = vmatpush.bf16.msra.mxu0 %v3707_v18  ;;  %1349 = vmatmul.bf16.gmra.mxu1 %v5633_v42  ;;  %v3630_v18 = vld [vmem:[%s4980_s10 + $0x80] sm:$0xf] }
  0xc6   : > { %1626 = vmatpush.bf16.msra.mxu1 %v3671_v22  ;;  %3598 = vmatmul.msk.bf16.vlgmr.msrb.gmra.mxu2 %vm545_vm0, %v5561_v6  ;;  %v4491_v6 = vld [vmem:[%s6727_s1 + $0x464] sm:$0xf]  ;;  %v3822_v22 = vld [vmem:[%s6727_s1 + $0x400] sm:$0xf]  ;;  %v5737_v27 = vor.u32 %v4440_v19, %v3630_v18  ;;  %v4512_v19 = vld [vmem:[%s6727_s1 + $0x4e4] sm:$0xf0] }
  0xc7   : > { %3597 = vmatmul.msk.bf16.gmra.mxu3 %vm545_vm0, %v5641_v45  ;;  %1969 = vmatpush.bf16.msrb.mxu2 %v3883_v62  ;;  %v3875_v13 = vor.u32 %v4491_v6, %v3872_v8  ;;  %v3823_v33 = vor.u32 %v4480_v23, %v3822_v22  ;;  %v3640_v62 = vld [vmem:[%s4980_s10 + $0x98] sm:$0xf0]  ;;  %v3990_v6 = vld [vmem:[%s6727_s1 + $0x4f0] sm:$0xf]  ;;  %v3982_v18 = vld [vmem:[%s6727_s1 + $0x4e0] sm:$0xf] }
  0xc8   : > { %1933 = vmatpush.bf16.msrb.mxu3 %v3863_v14  ;;  %v5829_v10 = vor.u32 %v4441_v58, %v3640_v62  ;;  %v4521_v22 = vld [vmem:[%s6727_s1 + $0x534] sm:$0xf]  ;;  %v4024_v23 = vld [vmem:[%s6727_s1 + $0x538] sm:$0xf0]  ;;  %v3983_v28 = vor.u32 %v4512_v19, %v3982_v18  ;;  %v3998_v62 = vld [vmem:[%s6727_s1 + $0x500] sm:$0xf] }
  0xc9   : > { %1661 = vmatpush.bf16.msra.mxu0 %v3699_v26  ;;  %v4488_v26 = vld [vmem:[%s6727_s1 + $0x444] sm:$0xf0]  ;;  %v4513_v58 = vld [vmem:[%s6727_s1 + $0x4f4] sm:$0xf] }
  0xca   : > { %1627 = vmatpush.bf16.msra.mxu1 %v3663_v30  ;;  %v3855_v30 = vor.u32 %v4488_v26, %v3854_v25  ;;  %v3808_v25 = vld [vmem:[%s6727_s1 + $0x3e8] sm:$0xf0]  ;;  %v4027_v26 = vor.u32 %v4521_v22, %v4024_v23  ;;  %v4517_v19 = vld [vmem:[%s6727_s1 + $0x514] sm:$0xf] }
  0xcb   : > { %1970 = vmatpush.bf16.msrb.mxu2 %v3875_v13  ;;  %v3816_v13 = vld [vmem:[%s6727_s1 + $0x3f8] sm:$0xf0]  ;;  %v4509_v23 = vld [vmem:[%s6727_s1 + $0x4d4] sm:$0xf] }
  0xcc   : > { %1934 = vmatpush.bf16.msrb.mxu3 %v3855_v30  ;;  %v3819_v21 = vor.u32 %v4477_v12, %v3816_v13  ;;  %v4520_v30 = vld [vmem:[%s6727_s1 + $0x524] sm:$0xf0] }
  0xcd   : > { %1662 = vmatpush.bf16.msra.mxu0 %v3691_v38  ;;  %v4483_v38 = vld [vmem:[%s6727_s1 + $0x424] sm:$0xf]  ;;  %v4015_v36 = vor.u32 %v4520_v30, %v4014_v29  ;;  %v3942_v29 = vld [vmem:[%s6727_s1 + $0x490] sm:$0xf]  ;;  %v4502_v30 = vld [vmem:[%s6727_s1 + $0x494] sm:$0xf0] }
  0xce   : > { %1628 = vmatpush.bf16.msra.mxu1 %v3655_v41  ;;  %v4489_v41 = vld [vmem:[%s6727_s1 + $0x454] sm:$0xf]  ;;  %v3843_v46 = vor.u32 %v4483_v38, %v3840_v39  ;;  %v3811_v39 = vor.u32 %v4475_v24, %v3808_v25  ;;  %v3976_v24 = vld [vmem:[%s6727_s1 + $0x4d8] sm:$0xf0] }
  0xd1   : > { %1663 = vmatpush.bf16.msra.mxu0 %v3683_v48  ;;  %v4481_v48 = vld [vmem:[%s6727_s1 + $0x414] sm:$0xf] }
  0xd2   : > { %1629 = vmatpush.bf16.msra.mxu1 %v3647_v51  ;;  %v580_v31 = vpop.f32.mrf.mxu1  ;;  %v3807_v51 = vor.u32 %v4476_v44, %v3806_v43  ;;  %v3835_v56 = vor.u32 %v4481_v48, %v3832_v49  ;;  %v4016_v43 = vld [vmem:[%s6727_s1 + $0x528] sm:$0xf0]  ;;  %v4006_v44 = vld [vmem:[%s6727_s1 + $0x510] sm:$0xf]  ;;  %v4467_v48 = vld [vmem:[%s4980_s10 + $0xa4] sm:$0xf] }
  0xd3   : > { %v3966_v49 = vld [vmem:[%s6727_s1 + $0x4c0] sm:$0xf] }
  0xd4   : > { %1387 = vmatmul.bf16.gmra.mxu0 %v5633_v42  ;;  %v3864_v42 = vld [vmem:[%s6727_s1 + $0x458] sm:$0xf0] }
  0xd5   : > { %1664 = vmatpush.bf16.msra.mxu0 %v3675_v60  ;;  %1630 = vmatmul.bf16.vlgmr.msra.gmra.mxu1 %v5737_v27  ;;  %v4442_v60 = vld [vmem:[%s4980_s10 + $0x94] sm:$0xf0] }
  0xd6   : > { %1908 = vmatpush.bf16.msrb.mxu1 %v3847_v54  ;;  %3599 = vmatmul.msk.bf16.gmra.mxu2 %vm545_vm0, %v5641_v45  ;;  %v3867_v45 = vor.u32 %v4489_v41, %v3864_v42  ;;  %v4487_v54 = vld [vmem:[%s6727_s1 + $0x444] sm:$0xf]  ;;  %v5817_v5 = vor.u32 %v4442_v60, %v3638_v59  ;;  %v3800_v41 = vld [vmem:[%s6727_s1 + $0x3d8] sm:$0xf0] }
  0xd7   : > { %3740 = vmatmul.msk.bf16.vlgmr.msra.gmra.mxu3 %vm545_vm0, %v5745_v32  ;;  %v3859_v57 = vor.u32 %v4487_v54, %v3856_v55  ;;  %v4519_v42 = vld [vmem:[%s6727_s1 + $0x524] sm:$0xf]  ;;  %v4468_v54 = vld [vmem:[%s4980_s10 + $0xa4] sm:$0xf0]  ;;  %v3992_v60 = vld [vmem:[%s6727_s1 + $0x4f8] sm:$0xf0] }
  0xd8   : > { %1971 = vmatpush.bf16.msrb.mxu2 %v3867_v45 }
  0xd9   : > { %1665 = vmatpush.bf16.msra.mxu0 %v3667_v7  ;;  %v5777_v47 = vpop.f32.mrf.mxu3  ;;  %v4514_v7 = vld [vmem:[%s6727_s1 + $0x4f4] sm:$0xf0] }
  0xda   : > { %1909 = vmatpush.bf16.msrb.mxu1 %v3839_v2  ;;  %v5785_v50 = vpop.f32.mrf.mxu1  ;;  %v4472_v2 = vld [vmem:[%s6727_s1 + $0x3c4] sm:$0xf0]  ;;  %v3991_v15 = vor.u32 %v4514_v7, %v3990_v6  ;;  %v3958_v6 = vld [vmem:[%s6727_s1 + $0x4b0] sm:$0xf]  ;;  %v4506_v7 = vld [vmem:[%s6727_s1 + $0x4b4] sm:$0xf0] }
  0xdb   : > { %v3791_v14 = vor.u32 %v4472_v2, %v3790_v1  ;;  %v3959_v18 = vor.u32 %v4506_v7, %v3958_v6 }
  0xdc   : > { %1972 = vmatpush.bf16.msrb.mxu2 %v3859_v57  ;;  %v3792_v57 = vld [vmem:[%s6727_s1 + $0x3c8] sm:$0xf0] }
  0xdd   : > { %1666 = vmatpush.bf16.msra.mxu0 %v3659_v20 }
  0xde   : > { %1910 = vmatpush.bf16.msrb.mxu1 %v3831_v16  ;;  %v4022_v16 = vld [vmem:[%s6727_s1 + $0x530] sm:$0xf] }
  0xdf   : > { %v4023_v20 = vor.u32 %v4522_v17, %v4022_v16  ;;  %v3995_v16 = vor.u32 %v4513_v58, %v3992_v60  ;;  %v4511_v17 = vld [vmem:[%s6727_s1 + $0x4e4] sm:$0xf] }
  0xe1   : > { %1667 = vmatpush.bf16.msra.mxu0 %v3651_v34  ;;  %v5815_v3 = vpop.f32.mrf.mxu3  ;;  %v561_v4 = vpop.f32.mrf.mxu0  ;;  %2217 = vmatpush.bf16.msra.mxu3 %v4023_v20  ;;  %v3974_v34 = vld [vmem:[%s6727_s1 + $0x4d0] sm:$0xf] }
  0xe2   : > { %1911 = vmatpush.bf16.msrb.mxu1 %v3823_v33  ;;  %v5825_v8 = vadd.f32 %v580_v31, %v561_v4  ;;  %v5827_v9 = vpop.f32.mrf.mxu1  ;;  %v3975_v45 = vor.u32 %v4510_v35, %v3974_v34  ;;  %v5940_v4 = vor.u32 %v4468_v54, %v3774_v53  ;;  %v4505_v53 = vld [vmem:[%s6727_s1 + $0x4b4] sm:$0xf]  ;;  %v3960_v54 = vld [vmem:[%s6727_s1 + $0x4b8] sm:$0xf0] }
  0xe3   : > { %v3963_v7 = vor.u32 %v4505_v53, %v3960_v54  ;;  %v4534_v54 = vld [vmem:[%s6727_s1 + $0x574] sm:$0xf0] }
  0xe4   : > { %1668 = vmatmul.bf16.vlgmr.msra.gmra.mxu0 %v5737_v27 }
  0xe5   : > { %1946 = vmatpush.bf16.msrb.mxu0 %v3851_v37  ;;  %1635 = vmatmul.bf16.gmra.mxu1 %v5817_v5 }
  0xe6   : > { %1912 = vmatpush.bf16.msrb.mxu1 %v3815_v40  ;;  %3742 = vmatmul.msk.bf16.vlgmr.msra.gmra.mxu2 %vm545_vm0, %v5745_v32  ;;  %v4473_v40 = vld [vmem:[%s6727_s1 + $0x3d4] sm:$0xf] }
  0xe7   : > { %3741 = vmatmul.msk.bf16.gmra.mxu3 %vm545_vm0, %v5829_v10  ;;  %2255 = vmatpush.bf16.msra.mxu2 %v4027_v26  ;;  %v3803_v55 = vor.u32 %v4473_v40, %v3800_v41  ;;  %v3968_v40 = vld [vmem:[%s6727_s1 + $0x4c8] sm:$0xf0]  ;;  %v3943_v41 = vor.u32 %v4502_v30, %v3942_v29  ;;  %v4499_v30 = vld [vmem:[%s6727_s1 + $0x484] sm:$0xf] }
  0xe8   : > { %2218 = vmatpush.bf16.msra.mxu3 %v4015_v36  ;;  %v3979_v36 = vor.u32 %v4509_v23, %v3976_v24 }
  0xe9   : > { %1947 = vmatpush.bf16.msrb.mxu0 %v3843_v46  ;;  %v599_v27 = vpop.f32.mrf.mxu2  ;;  %v563_v33 = vpop.f32.mrf.mxu0  ;;  %v4019_v46 = vor.u32 %v4519_v42, %v4016_v43  ;;  %v3934_v42 = vld [vmem:[%s6727_s1 + $0x480] sm:$0xf]  ;;  %v4500_v43 = vld [vmem:[%s6727_s1 + $0x484] sm:$0xf0] }
  0xea   : > { %1913 = vmatpush.bf16.msrb.mxu1 %v3807_v51  ;;  %v5874_v31 = vadd.f32 %v5777_v47, %v599_v27  ;;  %v5876_v32 = vpop.f32.mrf.mxu3  ;;  %v5885_v37 = vadd.f32 %v5785_v50, %v563_v33  ;;  %v5887_v38 = vpop.f32.mrf.mxu1  ;;  %v4518_v47 = vld [vmem:[%s6727_s1 + $0x514] sm:$0xf0]  ;;  %v4508_v50 = vld [vmem:[%s6727_s1 + $0x4c4] sm:$0xf0] }
  0xeb   : > { %v4007_v51 = vor.u32 %v4518_v47, %v4006_v44  ;;  %2256 = vmatpush.bf16.msra.mxu2 %v4019_v46  ;;  %v3782_v46 = vld [vmem:[%s4980_s10 + $0xb0] sm:$0xf]  ;;  %v4470_v47 = vld [vmem:[%s4980_s10 + $0xb4] sm:$0xf0] }
  0xed   : > { %1948 = vmatpush.bf16.msrb.mxu0 %v3835_v56  ;;  %v4471_v56 = vld [vmem:[%s6727_s1 + $0x3c4] sm:$0xf]  ;;  %2219 = vmatpush.bf16.msra.mxu3 %v4007_v51  ;;  %v4542_v51 = vld [vmem:[%s6727_s1 + $0x5b4] sm:$0xf0] }
  0xee   : > { %1914 = vmatpush.bf16.msrb.mxu1 %v3799_v61  ;;  %v3967_v61 = vor.u32 %v4508_v50, %v3966_v49  ;;  %v4134_v50 = vld [vmem:[%s6727_s1 + $0x5b0] sm:$0xf] }
  0xf1   : > { %1949 = vmatpush.bf16.msrb.mxu0 %v3827_v11  ;;  %v601_v59 = vpop.f32.mrf.mxu2  ;;  %v566_v2 = vpop.f32.mrf.mxu0  ;;  %v3999_v11 = vor.u32 %v4516_v63, %v3998_v62 }
  0xf2   : > { %1915 = vmatpush.bf16.msrb.mxu1 %v3791_v14  ;;  %v5936_v0 = vadd.f32 %v5815_v3, %v601_v59  ;;  %v5938_v1 = vpop.f32.mrf.mxu3  ;;  %v5949_v12 = vadd.f32 %v5827_v9, %v566_v2  ;;  %v781_v13 = vpop.f32.mrf.mxu1  ;;  %v5951_v3 = vor.u32 %v4467_v48, %v3776_v52  ;;  %v3795_v14 = vor.u32 %v4471_v56, %v3792_v57  ;;  %v3984_v9 = vld [vmem:[%s6727_s1 + $0x4e8] sm:$0xf0]  ;;  %v3784_v48 = vld [vmem:[%s4980_s10 + $0xb8] sm:$0xf0] }
  0xf3   : > { %2220 = vmatpush.bf16.msra.mxu3 %v3999_v11  ;;  %v3987_v20 = vor.u32 %v4511_v17, %v3984_v9  ;;  %v6036_v59 = vor.u32 %v4470_v47, %v3782_v46  ;;  %v4135_v2 = vor.u32 %v4542_v51, %v4134_v50  ;;  %v4126_v11 = vld [vmem:[%s6727_s1 + $0x5a0] sm:$0xf]  ;;  %v4168_v17 = vld [vmem:[%s6727_s1 + $0x5f8] sm:$0xf0]  ;;  %v4496_v46 = vld [vmem:[%s4980_s10 + $0xc4] sm:$0xf0] }
  0xf4   : > { %1673 = vmatmul.bf16.gmra.mxu0 %v5817_v5  ;;  %v4504_v5 = vld [vmem:[%s6727_s1 + $0x4a4] sm:$0xf0]  ;;  %v4541_v50 = vld [vmem:[%s6727_s1 + $0x5b4] sm:$0xf]  ;;  %v4136_v51 = vld [vmem:[%s6727_s1 + $0x5b8] sm:$0xf0] }
  0xf5   : > { %1950 = vmatpush.bf16.msrb.mxu0 %v3819_v21  ;;  %1916 = vmatmul.bf16.vlgmr.msrb.gmra.mxu1 %v5940_v4 }
  0xf6   : > { %2194 = vmatpush.bf16.msra.mxu1 %v3991_v15  ;;  %v782_v15 = vadd.f32 %v781_v13, %v5825_v8  ;;  %3743 = vmatmul.msk.bf16.gmra.mxu2 %vm545_vm0, %v5829_v10  ;;  %v3950_v8 = vld [vmem:[%s6727_s1 + $0x4a0] sm:$0xf]  ;;  %v4008_v10 = vld [vmem:[%s6727_s1 + $0x518] sm:$0xf0]  ;;  %v4540_v13 = vld [vmem:[%s6727_s1 + $0x5a4] sm:$0xf0] }
  0xf7   : > { %3884 = vmatmul.msk.bf16.vlgmr.msrb.gmra.mxu3 %vm545_vm0, %v5951_v3  ;;  %v4011_v21 = vor.u32 %v4517_v19, %v4008_v10  ;;  %v3951_v25 = vor.u32 %v4504_v5, %v3950_v8  ;;  %v4538_v8 = vld [vmem:[%s6727_s1 + $0x594] sm:$0xf0]  ;;  %v3944_v10 = vld [vmem:[%s6727_s1 + $0x498] sm:$0xf0] }
  0xf9   : > { %1951 = vmatpush.bf16.msrb.mxu0 %v3811_v39  ;;  %v604_v22 = vpop.f32.mrf.mxu2  ;;  %2257 = vmatpush.bf16.msra.mxu2 %v4011_v21  ;;  %v4507_v39 = vld [vmem:[%s6727_s1 + $0x4c4] sm:$0xf]  ;;  %v4548_v21 = vld [vmem:[%s6727_s1 + $0x5e4] sm:$0xf0] }
  0xfa   : > { %2195 = vmatpush.bf16.msra.mxu1 %v3983_v28  ;;  %v5985_v26 = vadd.f32 %v5876_v32, %v604_v22  ;;  %v800_v27 = vpop.f32.mrf.mxu3  ;;  %v568_v28 = vpop.f32.mrf.mxu0  ;;  %v3971_v49 = vor.u32 %v4507_v39, %v3968_v40  ;;  %v3936_v39 = vld [vmem:[%s6727_s1 + $0x488] sm:$0xf0]  ;;  %v4536_v40 = vld [vmem:[%s6727_s1 + $0x584] sm:$0xf0] }
  0xfb   : > { %v5993_v33 = vadd.f32 %v800_v27, %v782_v15  ;;  %v5996_v34 = vadd.f32 %v5887_v38, %v568_v28  ;;  %v783_v32 = vpop.f32.mrf.mxu1  ;;  %v4515_v38 = vld [vmem:[%s6727_s1 + $0x504] sm:$0xf] }
  0xfc   : > { %v784_v35 = vadd.f32 %v783_v32, %v5885_v37  ;;  %v4000_v37 = vld [vmem:[%s6727_s1 + $0x508] sm:$0xf0] }
  0xfd   : > { %1952 = vmatpush.bf16.msrb.mxu0 %v3803_v55  ;;  %v4003_v44 = vor.u32 %v4515_v38, %v4000_v37  ;;  %v3935_v55 = vor.u32 %v4500_v43, %v3934_v42  ;;  %v4150_v38 = vld [vmem:[%s6727_s1 + $0x5d0] sm:$0xf]  ;;  %v4495_v37 = vld [vmem:[%s4980_s10 + $0xc4] sm:$0xf]  ;;  %v4546_v43 = vld [vmem:[%s6727_s1 + $0x5d4] sm:$0xf0] }
  0xfe   : > { %2196 = vmatpush.bf16.msra.mxu1 %v3975_v45  ;;  %v4469_v45 = vld [vmem:[%s4980_s10 + $0xb4] sm:$0xf] }
  0xff   : > { %2258 = vmatpush.bf16.msra.mxu2 %v4003_v44  ;;  %v6041_v63 = vor.u32 %v4469_v45, %v3784_v48  ;;  %v3920_v44 = vld [vmem:[%s4980_s10 + $0xc8] sm:$0xf0]  ;;  %v3918_v45 = vld [vmem:[%s4980_s10 + $0xc0] sm:$0xf]  ;;  %v4151_v48 = vor.u32 %v4546_v43, %v4150_v38  ;;  %v3926_v38 = vld [vmem:[%s4980_s10 + $0xd0] sm:$0xf] }
 0x100   : > { %v3928_v43 = vld [vmem:[%s4980_s10 + $0xd8] sm:$0xf0] }
 0x101   : > { %1953 = vmatpush.bf16.msrb.mxu0 %v3795_v14  ;;  %v606_v52 = vpop.f32.mrf.mxu2  ;;  %v4550_v14 = vld [vmem:[%s6727_s1 + $0x5f4] sm:$0xf0] }
 0x102   : > { %2197 = vmatpush.bf16.msra.mxu1 %v3967_v61  ;;  %v6034_v56 = vadd.f32 %v5938_v1, %v606_v52  ;;  %v802_v57 = vpop.f32.mrf.mxu3  ;;  %v819_v58 = vpop.f32.mrf.mxu0  ;;  %v4503_v1 = vld [vmem:[%s6727_s1 + $0x4a4] sm:$0xf]  ;;  %v4102_v52 = vld [vmem:[%s6727_s1 + $0x570] sm:$0xf] }
 0x103   : > { %v6038_v60 = vadd.f32 %v802_v57, %v784_v35  ;;  %v786_v61 = vpop.f32.mrf.mxu1  ;;  %v820_v62 = vadd.f32 %v819_v58, %v5874_v31  ;;  %v3952_v31 = vld [vmem:[%s6727_s1 + $0x4a8] sm:$0xf0]  ;;  %v4544_v57 = vld [vmem:[%s6727_s1 + $0x5c4] sm:$0xf0] }
 0x104   : > { %v787_v6 = vadd.f32 %v786_v61, %v5949_v12  ;;  %1954 = vmatmul.bf16.vlgmr.msrb.gmra.mxu0 %v5940_v4  ;;  %v4166_v12 = vld [vmem:[%s6727_s1 + $0x5f0] sm:$0xf]  ;;  %v4127_v4 = vor.u32 %v4540_v13, %v4126_v11  ;;  %v3955_v9 = vor.u32 %v4503_v1, %v3952_v31  ;;  %v6151_v11 = vor.u32 %v4495_v37, %v3920_v44  ;;  %v4498_v37 = vld [vmem:[%s4980_s10 + $0xd4] sm:$0xf0]  ;;  %v4533_v44 = vld [vmem:[%s6727_s1 + $0x574] sm:$0xf] }
 0x105   : > { %2232 = vmatpush.bf16.msra.mxu0 %v3995_v16  ;;  %1921 = vmatmul.bf16.gmra.mxu1 %v6036_v59  ;;  %v4167_v15 = vor.u32 %v4550_v14, %v4166_v12  ;;  %v4549_v16 = vld [vmem:[%s6727_s1 + $0x5f4] sm:$0xf]  ;;  %v4139_v31 = vor.u32 %v4541_v50, %v4136_v51  ;;  %v4539_v12 = vld [vmem:[%s6727_s1 + $0x5a4] sm:$0xf]  ;;  %v4128_v14 = vld [vmem:[%s6727_s1 + $0x5a8] sm:$0xf0] }
 0x106   : > { %2198 = vmatpush.bf16.msra.mxu1 %v3959_v18  ;;  %3886 = vmatmul.msk.bf16.vlgmr.msrb.gmra.mxu2 %vm545_vm0, %v5951_v3  ;;  %v4501_v3 = vld [vmem:[%s6727_s1 + $0x494] sm:$0xf]  ;;  %v4118_v18 = vld [vmem:[%s6727_s1 + $0x590] sm:$0xf]  ;;  %v4171_v5 = vor.u32 %v4549_v16, %v4168_v17  ;;  %v4131_v16 = vor.u32 %v4539_v12, %v4128_v14  ;;  %v4152_v17 = vld [vmem:[%s6727_s1 + $0x5d8] sm:$0xf0] }
 0x107   : > { %3885 = vmatmul.msk.bf16.gmra.mxu3 %vm545_vm0, %v6041_v63  ;;  %v4119_v32 = vor.u32 %v4538_v8, %v4118_v18  ;;  %v4310_v12 = vld [vmem:[%s6727_s1 + $0x6b0] sm:$0xf]  ;;  %v4578_v14 = vld [vmem:[%s6727_s1 + $0x6b4] sm:$0xf0] }
 0x108   : > { %2503 = vmatpush.bf16.msrb.mxu3 %v4167_v15  ;;  %2541 = vmatpush.bf16.msrb.mxu2 %v4171_v5  ;;  %v4103_v15 = vor.u32 %v4534_v54, %v4102_v52  ;;  %v4086_v5 = vld [vmem:[%s6727_s1 + $0x550] sm:$0xf]  ;;  %v6231_v52 = vor.u32 %v4498_v37, %v3926_v38  ;;  %v4568_v54 = vld [vmem:[%s6727_s1 + $0x664] sm:$0xf0]  ;;  %v4574_v38 = vld [vmem:[%s6727_s1 + $0x694] sm:$0xf0] }
 0x109   : > { %2233 = vmatpush.bf16.msra.mxu0 %v3987_v20  ;;  %v838_v19 = vpop.f32.mrf.mxu2  ;;  %v4158_v20 = vld [vmem:[%s6727_s1 + $0x5e0] sm:$0xf] }
 0x10a   : > { %2199 = vmatpush.bf16.msra.mxu1 %v3951_v25  ;;  %v805_v22 = vpop.f32.mrf.mxu3  ;;  %v6092_v23 = vadd.f32 %v838_v19, %v820_v62  ;;  %v821_v24 = vpop.f32.mrf.mxu0  ;;  %v4159_v25 = vor.u32 %v4548_v21, %v4158_v20  ;;  %v4530_v19 = vld [vmem:[%s6727_s1 + $0x554] sm:$0xf0]  ;;  %v4062_v37 = vld [vmem:[%s4980_s10 + $0xe0] sm:$0xf] }
 0x10b   : > { %v6094_v27 = vadd.f32 %v805_v22, %v787_v6  ;;  %v788_v28 = vpop.f32.mrf.mxu1  ;;  %v822_v29 = vadd.f32 %v821_v24, %v5936_v0  ;;  %v4110_v0 = vld [vmem:[%s6727_s1 + $0x580] sm:$0xf] }
 0x10c   : > { %v789_v35 = vadd.f32 %v788_v28, %v5996_v34  ;;  %2504 = vmatpush.bf16.msrb.mxu3 %v4159_v25  ;;  %v4160_v34 = vld [vmem:[%s6727_s1 + $0x5e8] sm:$0xf0]  ;;  %v4111_v47 = vor.u32 %v4536_v40, %v4110_v0  ;;  %v4278_v40 = vld [vmem:[%s6727_s1 + $0x670] sm:$0xf] }
 0x10d   : > { %2234 = vmatpush.bf16.msra.mxu0 %v3979_v36  ;;  %v3947_v36 = vor.u32 %v4501_v3, %v3944_v10  ;;  %v4144_v0 = vld [vmem:[%s6727_s1 + $0x5c8] sm:$0xf0] }
 0x10e   : > { %2200 = vmatpush.bf16.msra.mxu1 %v3943_v41  ;;  %v4547_v41 = vld [vmem:[%s6727_s1 + $0x5e4] sm:$0xf] }
 0x10f   : > { %v4163_v42 = vor.u32 %v4547_v41, %v4160_v34  ;;  %v4497_v34 = vld [vmem:[%s4980_s10 + $0xd4] sm:$0xf] }
 0x110   : > { %2505 = vmatpush.bf16.msrb.mxu3 %v4151_v48 }
 0x111   : > { %2235 = vmatpush.bf16.msra.mxu0 %v3971_v49  ;;  %v3939_v49 = vor.u32 %v4499_v30, %v3936_v39  ;;  %2542 = vmatpush.bf16.msrb.mxu2 %v4163_v42  ;;  %v840_v53 = vpop.f32.mrf.mxu2  ;;  %v4112_v30 = vld [vmem:[%s6727_s1 + $0x588] sm:$0xf0]  ;;  %v4543_v39 = vld [vmem:[%s6727_s1 + $0x5c4] sm:$0xf] }
 0x112   : > { %2201 = vmatpush.bf16.msra.mxu1 %v3935_v55  ;;  %v4142_v55 = vld [vmem:[%s6727_s1 + $0x5c0] sm:$0xf]  ;;  %v807_v58 = vpop.f32.mrf.mxu3  ;;  %v6144_v61 = vadd.f32 %v840_v53, %v822_v29  ;;  %v824_v62 = vpop.f32.mrf.mxu0  ;;  %v4535_v29 = vld [vmem:[%s6727_s1 + $0x584] sm:$0xf]  ;;  %v4147_v41 = vor.u32 %v4543_v39, %v4144_v0 }
 0x113   : > { %v4143_v6 = vor.u32 %v4544_v57, %v4142_v55  ;;  %v825_v1 = vadd.f32 %v824_v62, %v5985_v26  ;;  %v1059_v13 = vpop.f32.mrf.mxu1  ;;  %v4094_v26 = vld [vmem:[%s6727_s1 + $0x560] sm:$0xf]  ;;  %v4115_v42 = vor.u32 %v4535_v29, %v4112_v30  ;;  %v6239_v57 = vor.u32 %v4497_v34, %v3928_v43  ;;  %v4527_v29 = vld [vmem:[%s6727_s1 + $0x544] sm:$0xf] }
 0x114   : > { %1959 = vmatmul.bf16.gmra.mxu0 %v6036_v59  ;;  %v4545_v59 = vld [vmem:[%s6727_s1 + $0x5d4] sm:$0xf]  ;;  %v4270_v53 = vld [vmem:[%s6727_s1 + $0x660] sm:$0xf]  ;;  %v4575_v0 = vld [vmem:[%s6727_s1 + $0x6a4] sm:$0xf] }
 0x115   : > { %2236 = vmatpush.bf16.msra.mxu0 %v3963_v7  ;;  %v6148_v7 = vadd.f32 %v807_v58, %v789_v35  ;;  %2506 = vmatpush.bf16.msrb.mxu3 %v4143_v6  ;;  %v4155_v18 = vor.u32 %v4545_v59, %v4152_v17  ;;  %v4531_v6 = vld [vmem:[%s6727_s1 + $0x564] sm:$0xf]  ;;  %v4088_v59 = vld [vmem:[%s6727_s1 + $0x558] sm:$0xf0] }
 0x116   : > { %2480 = vmatpush.bf16.msrb.mxu1 %v4135_v2  ;;  %v6146_v2 = vor.u32 %v4496_v46, %v3918_v45  ;;  %3887 = vmatmul.msk.bf16.gmra.mxu2 %vm545_vm0, %v6041_v63  ;;  %v4537_v63 = vld [vmem:[%s6727_s1 + $0x594] sm:$0xf]  ;;  %v4104_v45 = vld [vmem:[%s6727_s1 + $0x578] sm:$0xf0] }
 0x117   : > { %4028 = vmatmul.msk.bf16.vlgmr.msra.gmra.mxu3 %vm545_vm0, %v6151_v11  ;;  %2543 = vmatpush.bf16.msrb.mxu2 %v4155_v18  ;;  %v4107_v62 = vor.u32 %v4533_v44, %v4104_v45  ;;  %v4576_v18 = vld [vmem:[%s6727_s1 + $0x6a4] sm:$0xf0]  ;;  %v4523_v45 = vld [vmem:[%s4980_s10 + $0xe4] sm:$0xf] }
 0x118   : > { %2202 = vmatmul.bf16.vlgmr.msra.gmra.mxu1 %v6146_v2 }
 0x119   : > { %2237 = vmatpush.bf16.msra.mxu0 %v3955_v9  ;;  %v4120_v9 = vld [vmem:[%s6727_s1 + $0x598] sm:$0xf0]  ;;  %v843_v8 = vpop.f32.mrf.mxu2 }
 0x11a   : > { %2481 = vmatpush.bf16.msrb.mxu1 %v4127_v4  ;;  %v4532_v4 = vld [vmem:[%s6727_s1 + $0x564] sm:$0xf0]  ;;  %v6189_v10 = vadd.f32 %v843_v8, %v825_v1  ;;  %v1078_v20 = vpop.f32.mrf.mxu3  ;;  %v826_v21 = vpop.f32.mrf.mxu0  ;;  %v4123_v28 = vor.u32 %v4537_v63, %v4120_v9  ;;  %v4096_v1 = vld [vmem:[%s6727_s1 + $0x568] sm:$0xf0] }
 0x11b   : > { %v4095_v3 = vor.u32 %v4532_v4, %v4094_v26  ;;  %v1079_v22 = vadd.f32 %v1078_v20, %v1059_v13  ;;  %v827_v24 = vadd.f32 %v826_v21, %v6034_v56  ;;  %v1061_v25 = vpop.f32.mrf.mxu1  ;;  %v4078_v56 = vld [vmem:[%s6727_s1 + $0x540] sm:$0xf]  ;;  %2544 = vmatpush.bf16.msrb.mxu2 %v4147_v41  ;;  %v4099_v26 = vor.u32 %v4531_v6, %v4096_v1  ;;  %v4312_v4 = vld [vmem:[%s6727_s1 + $0x6b8] sm:$0xf0]  ;;  %v4564_v21 = vld [vmem:[%s6727_s1 + $0x644] sm:$0xf0] }
 0x11c   : > { %v4254_v20 = vld [vmem:[%s6727_s1 + $0x640] sm:$0xf]  ;;  %v4562_v41 = vld [vmem:[%s6727_s1 + $0x634] sm:$0xf0] }
 0x11d   : > { %2238 = vmatpush.bf16.msra.mxu0 %v3947_v36  ;;  %v6202_v35 = vadd.f32 %v1079_v22, %v5993_v33  ;;  %v4528_v36 = vld [vmem:[%s6727_s1 + $0x544] sm:$0xf0]  ;;  %v4570_v33 = vld [vmem:[%s6727_s1 + $0x674] sm:$0xf0] }
 0x11e   : > { %2482 = vmatpush.bf16.msrb.mxu1 %v4119_v32  ;;  %v4087_v32 = vor.u32 %v4530_v19, %v4086_v5  ;;  %v4079_v46 = vor.u32 %v4528_v36, %v4078_v56  ;;  %v4279_v48 = vor.u32 %v4570_v33, %v4278_v40  ;;  %v4569_v56 = vld [vmem:[%s6727_s1 + $0x674] sm:$0xf]  ;;  %v4280_v36 = vld [vmem:[%s6727_s1 + $0x678] sm:$0xf0]  ;;  %v4304_v40 = vld [vmem:[%s6727_s1 + $0x6a8] sm:$0xf0] }
 0x11f   : > { %v4294_v33 = vld [vmem:[%s6727_s1 + $0x690] sm:$0xf]  ;;  %v4307_v34 = vor.u32 %v4575_v0, %v4304_v40  ;;  %v4288_v40 = vld [vmem:[%s6727_s1 + $0x688] sm:$0xf0] }
 0x120   : > { %v4295_v44 = vor.u32 %v4574_v38, %v4294_v33 }
 0x121   : > { %2239 = vmatpush.bf16.msra.mxu0 %v3939_v49 }
 0x122   : > { %2483 = vmatpush.bf16.msrb.mxu1 %v4111_v47  ;;  %v845_v47 = vpop.f32.mrf.mxu2  ;;  %v1080_v50 = vpop.f32.mrf.mxu3 }
 0x123   : > { %v6229_v49 = vadd.f32 %v845_v47, %v827_v24  ;;  %v1097_v51 = vpop.f32.mrf.mxu0  ;;  %v1081_v55 = vadd.f32 %v1080_v50, %v1061_v25  ;;  %v1064_v58 = vpop.f32.mrf.mxu1  ;;  %v4283_v47 = vor.u32 %v4569_v56, %v4280_v36  ;;  %v4561_v56 = vld [vmem:[%s6727_s1 + $0x634] sm:$0xf] }
 0x124   : > { %2240 = vmatmul.bf16.vlgmr.msra.gmra.mxu0 %v6146_v2  ;;  %v4566_v2 = vld [vmem:[%s6727_s1 + $0x654] sm:$0xf0] }
 0x125   : > { %2518 = vmatpush.bf16.msrb.mxu0 %v4139_v31  ;;  %v6248_v13 = vadd.f32 %v1081_v55, %v6038_v60  ;;  %v4271_v31 = vor.u32 %v4568_v54, %v4270_v53  ;;  %v4262_v60 = vld [vmem:[%s6727_s1 + $0x650] sm:$0xf]  ;;  %v4286_v54 = vld [vmem:[%s6727_s1 + $0x680] sm:$0xf]  ;;  %v4572_v55 = vld [vmem:[%s6727_s1 + $0x684] sm:$0xf0] }
 0x126   : > { %2484 = vmatpush.bf16.msrb.mxu1 %v4103_v15  ;;  %4030 = vmatmul.msk.bf16.vlgmr.msra.gmra.mxu2 %vm545_vm0, %v6151_v11  ;;  %v4311_v15 = vor.u32 %v4578_v14, %v4310_v12  ;;  %v4577_v11 = vld [vmem:[%s6727_s1 + $0x6b4] sm:$0xf]  ;;  %v4263_v9 = vor.u32 %v4566_v2, %v4262_v60  ;;  %v4560_v12 = vld [vmem:[%s6727_s1 + $0x624] sm:$0xf0] }
 0x127   : > { %4029 = vmatmul.msk.bf16.gmra.mxu3 %vm545_vm0, %v6239_v57  ;;  %v4315_v17 = vor.u32 %v4577_v11, %v4312_v4  ;;  %v4287_v11 = vor.u32 %v4572_v55, %v4286_v54  ;;  %v4557_v55 = vld [vmem:[%s6727_s1 + $0x614] sm:$0xf] }
 0x128   : > { %2207 = vmatmul.bf16.gmra.mxu1 %v6231_v52  ;;  %2789 = vmatpush.bf16.msra.mxu3 %v4311_v15 }
 0x129   : > { %2519 = vmatpush.bf16.msrb.mxu0 %v4131_v16  ;;  %v4529_v16 = vld [vmem:[%s6727_s1 + $0x554] sm:$0xf]  ;;  %2827 = vmatpush.bf16.msra.mxu2 %v4315_v17 }
 0x12a   : > { %2485 = vmatpush.bf16.msrb.mxu1 %v4095_v3  ;;  %v1116_v63 = vpop.f32.mrf.mxu2  ;;  %v4302_v3 = vld [vmem:[%s6727_s1 + $0x6a0] sm:$0xf]  ;;  %v1083_v8 = vpop.f32.mrf.mxu3 }
 0x12b   : > { %v1117_v5 = vadd.f32 %v1116_v63, %v1097_v51  ;;  %v1099_v19 = vpop.f32.mrf.mxu0  ;;  %v4303_v22 = vor.u32 %v4576_v18, %v4302_v3  ;;  %v1084_v24 = vadd.f32 %v1083_v8, %v1064_v58  ;;  %v1066_v25 = vpop.f32.mrf.mxu1  ;;  %v4272_v51 = vld [vmem:[%s6727_s1 + $0x668] sm:$0xf0]  ;;  %v4563_v18 = vld [vmem:[%s6727_s1 + $0x644] sm:$0xf] }
 0x12c   : > { %v4256_v8 = vld [vmem:[%s6727_s1 + $0x648] sm:$0xf0] }
 0x12d   : > { %2520 = vmatpush.bf16.msrb.mxu0 %v4123_v28  ;;  %v4091_v28 = vor.u32 %v4529_v16, %v4088_v59  ;;  %v6296_v30 = vadd.f32 %v1117_v5, %v6092_v23  ;;  %2790 = vmatpush.bf16.msra.mxu3 %v4303_v22  ;;  %v6308_v39 = vadd.f32 %v1084_v24, %v6094_v27  ;;  %v4246_v27 = vld [vmem:[%s6727_s1 + $0x630] sm:$0xf]  ;;  %v4565_v16 = vld [vmem:[%s6727_s1 + $0x654] sm:$0xf]  ;;  %v4264_v59 = vld [vmem:[%s6727_s1 + $0x658] sm:$0xf0] }
 0x12e   : > { %2486 = vmatpush.bf16.msrb.mxu1 %v4087_v32  ;;  %v4080_v32 = vld [vmem:[%s6727_s1 + $0x548] sm:$0xf0]  ;;  %v4255_v23 = vor.u32 %v4564_v21, %v4254_v20  ;;  %2828 = vmatpush.bf16.msra.mxu2 %v4307_v34  ;;  %v4247_v53 = vor.u32 %v4562_v41, %v4246_v27  ;;  %v4267_v63 = vor.u32 %v4565_v16, %v4264_v59  ;;  %v4222_v22 = vld [vmem:[%s6727_s1 + $0x600] sm:$0xf]  ;;  %v4556_v24 = vld [vmem:[%s6727_s1 + $0x604] sm:$0xf0] }
 0x12f   : > { %v4083_v43 = vor.u32 %v4527_v29, %v4080_v32  ;;  %v4259_v32 = vor.u32 %v4563_v18, %v4256_v8  ;;  %v4223_v0 = vor.u32 %v4556_v24, %v4222_v22  ;;  %v4070_v27 = vld [vmem:[%s4980_s10 + $0xf0] sm:$0xf]  ;;  %v4526_v41 = vld [vmem:[%s4980_s10 + $0xf4] sm:$0xf0]  ;;  %v4525_v34 = vld [vmem:[%s4980_s10 + $0xf4] sm:$0xf] }
 0x130   : > { %v3312_v16 = vld [vmem:[%s4980_s10 + $0x40] sm:$0xff]  ;;  %v4554_v22 = vld [vmem:[%s4980_s10 + $0x114] sm:$0xf0] }
 0x131   : > { %2521 = vmatpush.bf16.msrb.mxu0 %v4115_v42  ;;  %v4524_v42 = vld [vmem:[%s4980_s10 + $0xe4] sm:$0xf0]  ;;  %2791 = vmatpush.bf16.msra.mxu3 %v4295_v44  ;;  %v4555_v59 = vld [vmem:[%s6727_s1 + $0x604] sm:$0xf] }
 0x132   : > { %2487 = vmatpush.bf16.msrb.mxu1 %v4079_v46  ;;  %v4064_v46 = vld [vmem:[%s4980_s10 + $0xe8] sm:$0xf0]  ;;  %v1118_v50 = vpop.f32.mrf.mxu2  ;;  %v1085_v58 = vpop.f32.mrf.mxu3  ;;  %v6344_v1 = vor.u32 %v4524_v42, %v4062_v37  ;;  %v4559_v42 = vld [vmem:[%s6727_s1 + $0x624] sm:$0xf] }
 0x133   : > { %v1102_v6 = vpop.f32.mrf.mxu0  ;;  %v1086_v14 = vadd.f32 %v1085_v58, %v1066_v25  ;;  %v6352_v60 = vor.u32 %v4523_v45, %v4064_v46  ;;  %v1345_v2 = vpop.f32.mrf.mxu1  ;;  %v4232_v58 = vld [vmem:[%s6727_s1 + $0x618] sm:$0xf0]  ;;  %v3456_v18 = vld [vmem:[%s4980_s10 + $0x60] sm:$0xff] }
 0x134   : > { %2245 = vmatmul.bf16.gmra.mxu0 %v6231_v52  ;;  %v4573_v52 = vld [vmem:[%s6727_s1 + $0x694] sm:$0xf] }
 0x135   : > { %2522 = vmatpush.bf16.msrb.mxu0 %v4107_v62  ;;  %v1119_v62 = vadd.f32 %v1118_v50, %v1099_v19  ;;  %v6358_v4 = vadd.f32 %v1086_v14, %v6148_v7  ;;  %v4558_v7 = vld [vmem:[%s6727_s1 + $0x614] sm:$0xf0]  ;;  %2792 = vmatpush.bf16.msra.mxu3 %v4287_v11 }
 0x136   : > { %2766 = vmatpush.bf16.msra.mxu1 %v4279_v48  ;;  %v4567_v48 = vld [vmem:[%s6727_s1 + $0x664] sm:$0xf]  ;;  %4031 = vmatmul.msk.bf16.gmra.mxu2 %vm545_vm0, %v6239_v57  ;;  %v4296_v57 = vld [vmem:[%s6727_s1 + $0x698] sm:$0xf0] }
 0x137   : > { %v6355_v15 = vadd.f32 %v1119_v62, %v6144_v61  ;;  %v4230_v61 = vld [vmem:[%s6727_s1 + $0x610] sm:$0xf]  ;;  %4172 = vmatmul.msk.bf16.vlgmr.msrb.gmra.mxu3 %vm545_vm0, %v6352_v60 }
 0x138   : > { %2488 = vmatmul.bf16.vlgmr.msrb.gmra.mxu1 %v6344_v1  ;;  %v4231_v5 = vor.u32 %v4558_v7, %v4230_v61 }
 0x139   : > { %2523 = vmatpush.bf16.msrb.mxu0 %v4099_v26  ;;  %v4275_v26 = vor.u32 %v4567_v48, %v4272_v51 }
 0x13a   : > { %2767 = vmatpush.bf16.msra.mxu1 %v4271_v31  ;;  %v4238_v31 = vld [vmem:[%s6727_s1 + $0x620] sm:$0xf]  ;;  %v1121_v3 = vpop.f32.mrf.mxu2  ;;  %v1364_v20 = vpop.f32.mrf.mxu3 }
 0x13b   : > { %v4239_v17 = vor.u32 %v4560_v12, %v4238_v31  ;;  %v1122_v19 = vadd.f32 %v1121_v3, %v1102_v6  ;;  %v1104_v21 = vpop.f32.mrf.mxu0  ;;  %v1365_v25 = vadd.f32 %v1364_v20, %v1345_v2  ;;  %v3052_v6 = vld [vmem:[%s4980_s10 + $0x20] sm:$0xff]  ;;  %v4208_v12 = vld [vmem:[%s4980_s10 + $0x108] sm:$0xf0]  ;;  %v4553_v3 = vld [vmem:[%s4980_s10 + $0x114] sm:$0xf] }
 0x13c   : > { %v4551_v31 = vld [vmem:[%s4980_s10 + $0x104] sm:$0xf]  ;;  %v857_v11 = vunpack.c.h.bf16 %v3052_v6  ;;  %v4216_v20 = vld [vmem:[%s4980_s10 + $0x118] sm:$0xf0] }
 0x13d   : > { %2524 = vmatpush.bf16.msrb.mxu0 %v4091_v28  ;;  %v1347_v28 = vpop.f32.mrf.mxu1  ;;  %v6397_v29 = vadd.f32 %v1122_v19, %v6189_v10  ;;  %v6403_v36 = vadd.f32 %v1365_v25, %v6202_v35  ;;  %v4571_v10 = vld [vmem:[%s6727_s1 + $0x684] sm:$0xf]  ;;  %v4072_v35 = vld [vmem:[%s4980_s10 + $0xf8] sm:$0xf0] }
 0x13e   : > { %2768 = vmatpush.bf16.msra.mxu1 %v4263_v9  ;;  %v4299_v9 = vor.u32 %v4573_v52, %v4296_v57  ;;  %v4291_v33 = vor.u32 %v4571_v10, %v4288_v40  ;;  %v6426_v50 = vor.u32 %v4525_v34, %v4072_v35  ;;  %v1142_v52 = vunpack.c.l.bf16 %v3312_v16  ;;  %v3600_v40 = vld [vmem:[%s4980_s10 + $0x80] sm:$0xff] }
 0x13f   : > { %v1143_v57 = vunpack.c.h.bf16 %v3312_v16  ;;  %v1429_v10 = vunpack.c.h.bf16 %v3456_v18  ;;  %v1715_v34 = vunpack.c.h.bf16 %v3600_v40 }
 0x140   : > { %2829 = vmatpush.bf16.msra.mxu2 %v4299_v9  ;;  %v6459_v9 = vor.u32 %v4551_v31, %v4208_v12 }
 0x141   : > { %2525 = vmatpush.bf16.msrb.mxu0 %v4083_v43  ;;  %v4240_v43 = vld [vmem:[%s6727_s1 + $0x628] sm:$0xf0] }
 0x142   : > { %2769 = vmatpush.bf16.msra.mxu1 %v4255_v23  ;;  %v4248_v23 = vld [vmem:[%s6727_s1 + $0x638] sm:$0xf0]  ;;  %v1123_v37 = vpop.f32.mrf.mxu2  ;;  %v1366_v45 = vpop.f32.mrf.mxu3  ;;  %v4243_v54 = vor.u32 %v4559_v42, %v4240_v43  ;;  %v3744_v43 = vld [vmem:[%s4980_s10 + $0xa0] sm:$0xff] }
 0x143   : > { %v4251_v38 = vor.u32 %v4561_v56, %v4248_v23  ;;  %v1124_v44 = vadd.f32 %v1123_v37, %v1104_v21  ;;  %v1383_v46 = vpop.f32.mrf.mxu0  ;;  %v1367_v48 = vadd.f32 %v1366_v45, %v1347_v28  ;;  %v4214_v21 = vld [vmem:[%s4980_s10 + $0x110] sm:$0xf]  ;;  %v1428_v28 = vunpack.c.l.bf16 %v3456_v18  ;;  %v3053_v45 = vld [vmem:[%s4980_s10 + $0x28] sm:$0xff] }
 0x144   : > { %2830 = vmatpush.bf16.msra.mxu2 %v4291_v33  ;;  %2526 = vmatmul.bf16.vlgmr.msrb.gmra.mxu0 %v6344_v1  ;;  %v4235_v1 = vor.u32 %v4557_v55, %v4232_v58  ;;  %v6477_v37 = vor.u32 %v4554_v22, %v4214_v21  ;;  %v3888_v55 = vld [vmem:[%s4980_s10 + $0xc0] sm:$0xff]  ;;  %v3601_v22 = vld [vmem:[%s4980_s10 + $0x88] sm:$0xff] }
 0x145   : > { %2804 = vmatpush.bf16.msra.mxu0 %v4283_v47  ;;  %v6424_v47 = vor.u32 %v4526_v41, %v4070_v27  ;;  %v1350_v51 = vpop.f32.mrf.mxu1  ;;  %v6438_v62 = vadd.f32 %v1367_v48, %v6248_v13  ;;  %v4206_v13 = vld [vmem:[%s4980_s10 + $0x100] sm:$0xf]  ;;  %v1714_v41 = vunpack.c.l.bf16 %v3600_v40  ;;  %v2001_v48 = vunpack.c.h.bf16 %v3744_v43  ;;  %v3745_v40 = vld [vmem:[%s4980_s10 + $0xa8] sm:$0xff] }
 0x146   : > { %2770 = vmatpush.bf16.msra.mxu1 %v4247_v53  ;;  %v6429_v53 = vadd.f32 %v1124_v44, %v6229_v49  ;;  %v349_v49 = vld [vmem:[%s4980_s10] sm:$0xff]  ;;  %4174 = vmatmul.msk.bf16.vlgmr.msrb.gmra.mxu2 %vm545_vm0, %v6352_v60  ;;  %v4552_v60 = vld [vmem:[%s4980_s10 + $0x104] sm:$0xf0]  ;;  %v2286_v12 = vunpack.c.l.bf16 %v3888_v55 }
 0x147   : > { %v848_v14 = vunpack.c.l.bf16 %v349_v49  ;;  %v849_v2 = vunpack.c.h.bf16 %v349_v49  ;;  %4173 = vmatmul.msk.bf16.gmra.mxu3 %vm545_vm0, %v6426_v50  ;;  %v6466_v23 = vor.u32 %v4552_v60, %v4206_v13  ;;  %v350_v44 = vld [vmem:[%s4980_s10 + $0x8] sm:$0xff]  ;;  %v858_v49 = vunpack.c.l.bf16 %v3053_v45  ;;  %v4032_v13 = vld [vmem:[%s4980_s10 + $0xe0] sm:$0xff] }
 0x148   : > { %2493 = vmatmul.bf16.gmra.mxu1 %v6424_v47  ;;  %v851_v58 = vunpack.c.h.bf16 %v350_v44 }
 0x149   : > { %2805 = vmatpush.bf16.msra.mxu0 %v4275_v26  ;;  %v856_v26 = vunpack.c.l.bf16 %v3052_v6  ;;  %v865_v7 = vmax.f32 %v849_v2, %v857_v11  ;;  %v3313_v6 = vld [vmem:[%s4980_s10 + $0x48] sm:$0xff] }
 0x14a   : > { %2771 = vmatpush.bf16.msra.mxu1 %v4239_v17  ;;  %v4224_v17 = vld [vmem:[%s6727_s1 + $0x608] sm:$0xf0]  ;;  %v1369_v8 = vpop.f32.mrf.mxu3  ;;  %v1144_v2 = vunpack.c.l.bf16 %v3313_v6  ;;  %v1145_v60 = vunpack.c.h.bf16 %v3313_v6 }
 0x14b   : > { %v864_v61 = vmax.f32 %v848_v14, %v856_v26  ;;  %v1385_v19 = vpop.f32.mrf.mxu0  ;;  %v1151_v25 = vmax.f32 %v865_v7, %v1143_v57  ;;  %v2287_v14 = vunpack.c.h.bf16 %v3888_v55  ;;  %v2573_v57 = vunpack.c.h.bf16 %v4032_v13 }
 0x14d   : > { %2806 = vmatpush.bf16.msra.mxu0 %v4267_v63  ;;  %v1402_v63 = vpop.f32.mrf.mxu2  ;;  %v1150_v24 = vmax.f32 %v864_v61, %v1142_v52  ;;  %v1352_v56 = vpop.f32.mrf.mxu1  ;;  %v1437_v42 = vmax.f32 %v1151_v25, %v1429_v10  ;;  %v2572_v52 = vunpack.c.l.bf16 %v4032_v13 }
 0x14e   : > { %2772 = vmatpush.bf16.msra.mxu1 %v4231_v5  ;;  %v1403_v5 = vadd.f32 %v1402_v63, %v1383_v46  ;;  %v3457_v63 = vld [vmem:[%s4980_s10 + $0x68] sm:$0xff] }
 0x14f   : > { %v1436_v27 = vmax.f32 %v1150_v24, %v1428_v28  ;;  %v1431_v10 = vunpack.c.h.bf16 %v3457_v63 }
 0x150   : > { %v6470_v33 = vadd.f32 %v1403_v5, %v6296_v30  ;;  %v2000_v30 = vunpack.c.l.bf16 %v3744_v43  ;;  %v4176_v5 = vld [vmem:[%s4980_s10 + $0x100] sm:$0xff] }
 0x151   : > { %2807 = vmatpush.bf16.msra.mxu0 %v4259_v32  ;;  %v1370_v32 = vadd.f32 %v1369_v8, %v1350_v51  ;;  %v1722_v46 = vmax.f32 %v1436_v27, %v1714_v41  ;;  %v850_v51 = vunpack.c.l.bf16 %v350_v44  ;;  %v2859_v28 = vunpack.c.h.bf16 %v4176_v5  ;;  %v351_v27 = vld [vmem:[%s4980_s10 + $0x10] sm:$0xff] }
 0x152   : > { %2773 = vmatpush.bf16.msra.mxu1 %v4223_v0  ;;  %v4227_v0 = vor.u32 %v4555_v59, %v4224_v17  ;;  %v1371_v59 = vpop.f32.mrf.mxu3  ;;  %v1716_v41 = vunpack.c.l.bf16 %v3601_v22 }
 0x153   : > { %v6473_v35 = vadd.f32 %v1370_v32, %v6308_v39  ;;  %v859_v39 = vunpack.c.h.bf16 %v3053_v45  ;;  %v2008_v31 = vmax.f32 %v1722_v46, %v2000_v30  ;;  %v1388_v61 = vpop.f32.mrf.mxu0  ;;  %v2003_v45 = vunpack.c.h.bf16 %v3745_v40  ;;  %v3889_v46 = vld [vmem:[%s4980_s10 + $0xc8] sm:$0xff] }
 0x154   : > { %2531 = vmatmul.bf16.gmra.mxu0 %v6424_v47  ;;  %v2288_v30 = vunpack.c.l.bf16 %v3889_v46 }
 0x155   : > { %2808 = vmatpush.bf16.msra.mxu0 %v4251_v38  ;;  %v6475_v38 = vor.u32 %v4553_v3, %v4216_v20  ;;  %v1404_v26 = vpop.f32.mrf.mxu2  ;;  %v867_v16 = vmax.f32 %v851_v58, %v859_v39  ;;  %v2294_v7 = vmax.f32 %v2008_v31, %v2286_v12  ;;  %v1372_v3 = vadd.f32 %v1371_v59, %v1352_v56  ;;  %v1631_v18 = vpop.f32.mrf.mxu1 }
 0x156   : > { %v1405_v17 = vadd.f32 %v1404_v26, %v1385_v19  ;;  %v2858_v19 = vunpack.c.l.bf16 %v4176_v5  ;;  %4175 = vmatmul.msk.bf16.gmra.mxu2 %vm545_vm0, %v6426_v50  ;;  %v853_v50 = vunpack.c.h.bf16 %v351_v27 }
 0x157   : > { %v1153_v21 = vmax.f32 %v867_v16, %v1145_v60  ;;  %v2580_v25 = vmax.f32 %v2294_v7, %v2572_v52  ;;  %v6492_v32 = vadd.f32 %v1372_v3, %v6358_v4  ;;  %v3054_v4 = vld [vmem:[%s4980_s10 + $0x30] sm:$0xff]  ;;  %4316 = vmatmul.msk.bf16.vlgmr.msra.gmra.mxu3 %vm545_vm0, %v6459_v9  ;;  %v4177_v16 = vld [vmem:[%s4980_s10 + $0x108] sm:$0xff] }
 0x158   : > { %v6489_v24 = vadd.f32 %v1405_v17, %v6355_v15  ;;  %2774 = vmatmul.bf16.vlgmr.msra.gmra.mxu1 %v6466_v23  ;;  %v860_v39 = vunpack.c.l.bf16 %v3054_v4  ;;  %v861_v26 = vunpack.c.h.bf16 %v3054_v4  ;;  %v3314_v60 = vld [vmem:[%s4980_s10 + $0x50] sm:$0xff]  ;;  %v2860_v7 = vunpack.c.l.bf16 %v4177_v16 }
 0x159   : > { %2809 = vmatpush.bf16.msra.mxu0 %v4243_v54  ;;  %v1723_v54 = vmax.f32 %v1437_v42, %v1715_v34  ;;  %v2866_v15 = vmax.f32 %v2580_v25, %v2858_v19  ;;  %v1717_v34 = vunpack.c.h.bf16 %v3601_v22  ;;  %v2002_v42 = vunpack.c.l.bf16 %v3745_v40  ;;  %v3746_v25 = vld [vmem:[%s4980_s10 + $0xb0] sm:$0xff] }
 0x15a   : > { %v1439_v44 = vmax.f32 %v1153_v21, %v1431_v10  ;;  %v1650_v31 = vpop.f32.mrf.mxu3  ;;  %v2861_v52 = vunpack.c.h.bf16 %v4177_v16  ;;  %v1146_v21 = vunpack.c.l.bf16 %v3314_v60  ;;  %v1147_v22 = vunpack.c.h.bf16 %v3314_v60  ;;  %v3459_v60 = vld [vmem:[%s4980_s10 + $0x78] sm:$0xff] }
 0x15b   : > { %v2009_v11 = vmax.f32 %v1723_v54, %v2001_v48  ;;  %v2289_v48 = vunpack.c.h.bf16 %v3889_v46  ;;  %v1390_v12 = vpop.f32.mrf.mxu0 }
 0x15c   : > { %v1725_v58 = vmax.f32 %v1439_v44, %v1717_v34  ;;  %v2004_v34 = vunpack.c.l.bf16 %v3746_v25 }
 0x15d   : > { %2810 = vmatpush.bf16.msra.mxu0 %v4235_v1  ;;  %v866_v1 = vmax.f32 %v850_v51, %v858_v49  ;;  %v2295_v8 = vmax.f32 %v2009_v11, %v2287_v14  ;;  %v852_v51 = vunpack.c.l.bf16 %v351_v27  ;;  %v1407_v54 = vpop.f32.mrf.mxu2  ;;  %v4033_v49 = vld [vmem:[%s4980_s10 + $0xe8] sm:$0xff]  ;;  %v1651_v11 = vadd.f32 %v1650_v31, %v1631_v18  ;;  %v1633_v13 = vpop.f32.mrf.mxu1 }
 0x15e   : > { %v1408_v6 = vadd.f32 %v1407_v54, %v1388_v61  ;;  %v2574_v14 = vunpack.c.l.bf16 %v4033_v49  ;;  %v2011_v17 = vmax.f32 %v1725_v58, %v2003_v45  ;;  %v3602_v61 = vld [vmem:[%s4980_s10 + $0x90] sm:$0xff] }
 0x15f   : > { %v1152_v20 = vmax.f32 %v866_v1, %v1144_v2  ;;  %v2581_v56 = vmax.f32 %v2295_v8, %v2573_v57  ;;  %v2575_v2 = vunpack.c.h.bf16 %v4033_v49  ;;  %v3458_v57 = vld [vmem:[%s4980_s10 + $0x70] sm:$0xff]  ;;  %v868_v18 = vmax.f32 %v852_v51, %v860_v39  ;;  %v352_v51 = vld [vmem:[%s4980_s10 + $0x18] sm:$0xff] }
 0x160   : > { %v6508_v59 = vadd.f32 %v1408_v6, %v6397_v29  ;;  %v2297_v5 = vmax.f32 %v2011_v17, %v2289_v48  ;;  %v1432_v19 = vunpack.c.l.bf16 %v3458_v57  ;;  %v1719_v27 = vunpack.c.h.bf16 %v3602_v61  ;;  %v4178_v39 = vld [vmem:[%s4980_s10 + $0x110] sm:$0xff] }
 0x161   : > { %2811 = vmatpush.bf16.msra.mxu0 %v4227_v0  ;;  %v1430_v0 = vunpack.c.l.bf16 %v3457_v63  ;;  %v2867_v47 = vmax.f32 %v2581_v56, %v2859_v28  ;;  %v6513_v63 = vadd.f32 %v1651_v11, %v6403_v36  ;;  %v1433_v28 = vunpack.c.h.bf16 %v3458_v57 }
 0x162   : > { %v1718_v56 = vunpack.c.l.bf16 %v3602_v61  ;;  %v2583_v10 = vmax.f32 %v2297_v5, %v2575_v2  ;;  %v1154_v36 = vmax.f32 %v868_v18, %v1146_v21  ;;  %v1652_v44 = vpop.f32.mrf.mxu3  ;;  %v3315_v2 = vld [vmem:[%s4980_s10 + $0x58] sm:$0xff]  ;;  %v2862_v11 = vunpack.c.l.bf16 %v4178_v39 }
 0x163   : > { %v1438_v43 = vmax.f32 %v1152_v20, %v1430_v0  ;;  %v4625_v3 = vpack.i.bf16 %v2867_v47, %v2866_v15  ;;  %v869_v20 = vmax.f32 %v853_v50, %v861_v26  ;;  %v3890_v0 = vld [vmem:[%s4980_s10 + $0xd0] sm:$0xff]  ;;  %v1669_v45 = vpop.f32.mrf.mxu0  ;;  %v1653_v50 = vadd.f32 %v1652_v44, %v1633_v13 }
 0x164   : > { %v2290_v4 = vunpack.c.l.bf16 %v3890_v0  ;;  %v4034_v47 = vld [vmem:[%s4980_s10 + $0xf0] sm:$0xff]  ;;  %v2869_v46 = vmax.f32 %v2583_v10, %v2861_v52  ;;  %2812 = vmatmul.bf16.vlgmr.msra.gmra.mxu0 %v6466_v23  ;;  %v2863_v13 = vunpack.c.h.bf16 %v4178_v39  ;;  %v855_v17 = vunpack.c.h.bf16 %v352_v51  ;;  %v3603_v23 = vld [vmem:[%s4980_s10 + $0x98] sm:$0xff] }
 0x165   : > { %v1724_v55 = vmax.f32 %v1438_v43, %v1716_v41  ;;  %4626 = vrot.lane.b32.xlu0 %v4625_v3, %s4709_s24  ;;  %v1155_v40 = vmax.f32 %v869_v20, %v1147_v22  ;;  %v1409_v15 = vpop.f32.mrf.mxu2  ;;  %v1636_v54 = vpop.f32.mrf.mxu1  ;;  %v2576_v58 = vunpack.c.l.bf16 %v4034_v47  ;;  %v2577_v49 = vunpack.c.h.bf16 %v4034_v47  ;;  %v3747_v22 = vld [vmem:[%s4980_s10 + $0xb8] sm:$0xff] }
 0x166   : > { %v1410_v43 = vadd.f32 %v1409_v15, %v1390_v12  ;;  %v6527_v26 = vadd.f32 %v1653_v50, %v6438_v62  ;;  %4318 = vmatmul.msk.bf16.vlgmr.msra.gmra.mxu2 %vm545_vm0, %v6459_v9  ;;  %v1148_v52 = vunpack.c.l.bf16 %v3315_v2  ;;  %v1434_v20 = vunpack.c.l.bf16 %v3459_v60  ;;  %v3891_v47 = vld [vmem:[%s4980_s10 + $0xd8] sm:$0xff] }
 0x167   : > { %v2010_v1 = vmax.f32 %v1724_v55, %v2002_v42  ;;  %v2005_v42 = vunpack.c.h.bf16 %v3746_v25  ;;  %v1441_v48 = vmax.f32 %v1155_v40, %v1433_v28  ;;  %v2291_v55 = vunpack.c.h.bf16 %v3890_v0  ;;  %4317 = vmatmul.msk.bf16.gmra.mxu3 %vm545_vm0, %v6475_v38 }
 0x168   : > { %v6522_v6 = vadd.f32 %v1410_v43, %v6429_v53  ;;  %2779 = vmatmul.bf16.gmra.mxu1 %v6477_v37  ;;  %v1435_v21 = vunpack.c.h.bf16 %v3459_v60  ;;  %v1720_v0 = vunpack.c.l.bf16 %v3603_v23  ;;  %v1721_v15 = vunpack.c.h.bf16 %v3603_v23 }
 0x169   : > { %v2296_v8 = vmax.f32 %v2010_v1, %v2288_v30  ;;  %v1440_v30 = vmax.f32 %v1154_v36, %v1432_v19  ;;  %v1727_v12 = vmax.f32 %v1441_v48, %v1719_v27  ;;  %v854_v1 = vunpack.c.l.bf16 %v352_v51 }
 0x16a   : > { %v1655_v25 = vpop.f32.mrf.mxu3  ;;  %v2292_v50 = vunpack.c.l.bf16 %v3891_v47 }
 0x16b   : > { %v2582_v29 = vmax.f32 %v2296_v8, %v2574_v14  ;;  %v1726_v31 = vmax.f32 %v1440_v30, %v1718_v56  ;;  %v3055_v14 = vld [vmem:[%s4980_s10 + $0x38] sm:$0xff]  ;;  %v2013_v16 = vmax.f32 %v1727_v12, %v2005_v42  ;;  %v1149_v8 = vunpack.c.h.bf16 %v3315_v2  ;;  %v1671_v19 = vpop.f32.mrf.mxu0 }
 0x16c   : > { %v862_v62 = vunpack.c.l.bf16 %v3055_v14  ;;  %v1656_v10 = vadd.f32 %v1655_v25, %v1636_v54  ;;  %v4035_v30 = vld [vmem:[%s4980_s10 + $0xf8] sm:$0xff]  ;;  %v2293_v54 = vunpack.c.h.bf16 %v3891_v47 }
 0x16d   : > { %v2868_v41 = vmax.f32 %v2582_v29, %v2860_v7  ;;  %v2012_v53 = vmax.f32 %v1726_v31, %v2004_v34  ;;  %v863_v7 = vunpack.c.h.bf16 %v3055_v14  ;;  %v2299_v3 = vmax.f32 %v2013_v16, %v2291_v55  ;;  %v1688_v18 = vpop.f32.mrf.mxu2  ;;  %v1638_v36 = vpop.f32.mrf.mxu1  ;;  %v4179_v55 = vld [vmem:[%s4980_s10 + $0x118] sm:$0xff]  ;;  %s4581_s10 = smul.u32 96, %s4959_s20 }
 0x16e   : > { %v870_v9 = vmax.f32 %v854_v1, %v862_v62  ;;  %v1689_v29 = vadd.f32 %v1688_v18, %v1669_v45  ;;  %v1702_v43 = vadd.f32 %v1656_v10, %v6473_v35  ;;  %v2579_v31 = vunpack.c.h.bf16 %v4035_v30 }
 0x16f   : > { %v4630_v57 = vpack.i.bf16 %v2869_v46, %v2868_v41  ;;  %v2298_v61 = vmax.f32 %v2012_v53, %v2290_v4  ;;  %v871_v5 = vmax.f32 %v855_v17, %v863_v7  ;;  %v2585_v56 = vmax.f32 %v2299_v3, %v2577_v49  ;;  %s6608_s26 = scalar_lea.vmem [#allocation3], %s4581_s10 }
 0x170   : > { %v1156_v40 = vmax.f32 %v870_v9, %v1148_v52  ;;  %v6540_v41 = vadd.f32 %v1689_v29, %v6470_v33  ;;  %v2006_v4 = vunpack.c.l.bf16 %v3747_v22  ;;  %v2007_v46 = vunpack.c.h.bf16 %v3747_v22  ;;  %s2974_s16 = sshll.u32 %s6608_s26, 4  ;;  %s2975_s16 = int_to_ptr.vmem [resolvable:$true] %s2974_s16 }
 0x171   : > { %4631 = vrot.lane.b32.xlu0 %v4630_v57, %s4709_s24  ;;  %v2584_v28 = vmax.f32 %v2298_v61, %v2576_v58  ;;  %v1157_v27 = vmax.f32 %v871_v5, %v1149_v8  ;;  %v2871_v42 = vmax.f32 %v2585_v56, %v2863_v13  ;;  %v2578_v33 = vunpack.c.l.bf16 %v4035_v30 }
 0x172   : > { %v1442_v44 = vmax.f32 %v1156_v40, %v1434_v20  ;;  %v1657_v12 = vpop.f32.mrf.mxu3  ;;  %v2864_v13 = vunpack.c.l.bf16 %v4179_v55  ;;  %v2865_v60 = vunpack.c.h.bf16 %v4179_v55 }
 0x173   : > { %v2870_v34 = vmax.f32 %v2584_v28, %v2862_v11  ;;  %v1443_v45 = vmax.f32 %v1157_v27, %v1435_v21  ;;  %v1674_v2 = vpop.f32.mrf.mxu0  ;;  %v1658_v35 = vadd.f32 %v1657_v12, %v1638_v36 }
 0x174   : > { %v1728_v48 = vmax.f32 %v1442_v44, %v1720_v0  ;;  %2817 = vmatmul.bf16.gmra.mxu0 %v6477_v37 }
 0x175   : > { %v1729_v51 = vmax.f32 %v1443_v45, %v1721_v15  ;;  %v1690_v58 = vpop.f32.mrf.mxu2  ;;  %v4635_v11 = vpack.i.bf16 %v2871_v42, %v2870_v34  ;;  %v1917_v1 = vpop.f32.mrf.mxu1  ;;  %v1704_v62 = vadd.f32 %v1658_v35, %v6492_v32 }
 0x176   : > { %v2014_v49 = vmax.f32 %v1728_v48, %v2006_v4  ;;  %v1691_v14 = vadd.f32 %v1690_v58, %v1671_v19  ;;  %4319 = vmatmul.msk.bf16.gmra.mxu2 %vm545_vm0, %v6475_v38 }
 0x177   : > { %v2015_v39 = vmax.f32 %v1729_v51, %v2007_v46  ;;  %4636 = vrot.lane.b32.xlu1 %v4635_v11, %s4709_s24 }
 0x178   : > { %v2300_v53 = vmax.f32 %v2014_v49, %v2292_v50  ;;  %v1701_v17 = vadd.f32 %v1691_v14, %v6489_v24 }
 0x179   : > { %v2301_v16 = vmax.f32 %v2015_v39, %v2293_v54 }
 0x17a   : > { %v2586_v7 = vmax.f32 %v2300_v53, %v2578_v33  ;;  %v1936_v8 = vpop.f32.mrf.mxu3 }
 0x17b   : > { %v2587_v52 = vmax.f32 %v2301_v16, %v2579_v31  ;;  %v1676_v18 = vpop.f32.mrf.mxu0  ;;  %v1937_v9 = vadd.f32 %v1936_v8, %v1917_v1 }
 0x17c   : > { %v2872_v23 = vmax.f32 %v2586_v7, %v2864_v13 }
 0x17d   : > { %v2873_v57 = vmax.f32 %v2587_v52, %v2865_v60  ;;  %v1693_v61 = vpop.f32.mrf.mxu2  ;;  %v1919_v5 = vpop.f32.mrf.mxu1  ;;  %v6554_v20 = vadd.f32 %v1937_v9, %v6513_v63 }
 0x17e   : > { %v1694_v3 = vadd.f32 %v1693_v61, %v1674_v2 }
 0x17f   : > { %v4640_v32 = vpack.i.bf16 %v2873_v57, %v2872_v23 }
 0x180   : > { %v1703_v24 = vadd.f32 %v1694_v3, %v6508_v59 }
 0x181   : > { %4641 = vrot.lane.b32.xlu1 %v4640_v32, %s4709_s24 }
 0x182   : > { %v1938_v22 = vpop.f32.mrf.mxu3 }
 0x183   : > { %v1955_v38 = vpop.f32.mrf.mxu0  ;;  %v1939_v25 = vadd.f32 %v1938_v22, %v1919_v5 }
 0x185   : > { %v1695_v37 = vpop.f32.mrf.mxu2  ;;  %v1922_v29 = vpop.f32.mrf.mxu1  ;;  %v6559_v28 = vadd.f32 %v1939_v25, %v6527_v26 }
 0x186   : > { %v1696_v21 = vadd.f32 %v1695_v37, %v1676_v18 }
 0x188   : > { %v1705_v19 = vadd.f32 %v1696_v21, %v6522_v6 }
 0x18a   : > { %v1941_v0 = vpop.f32.mrf.mxu3 }
 0x18b   : > { %v1957_v10 = vpop.f32.mrf.mxu0  ;;  %v1942_v63 = vadd.f32 %v1941_v0, %v1922_v29 }
 0x18d   : > { %v1974_v56 = vpop.f32.mrf.mxu2  ;;  %v1924_v36 = vpop.f32.mrf.mxu1  ;;  %v6564_v27 = vadd.f32 %v1942_v63, %v1702_v43 }
 0x18e   : > { %v1975_v59 = vadd.f32 %v1974_v56, %v1955_v38  ;;  %v2878_v38 = vld [vmem:[%s6728_s2] sm:$0x3] }
 0x190   : > { %v6562_v40 = vadd.f32 %v1975_v59, %v6540_v41 }
 0x192   : > { %v1943_v34 = vpop.f32.mrf.mxu3 }
 0x193   : > { %v1960_v4 = vpop.f32.mrf.mxu0  ;;  %v1944_v47 = vadd.f32 %v1943_v34, %v1924_v36 }
 0x195   : > { %v1976_v15 = vpop.f32.mrf.mxu2  ;;  %v2203_v6 = vpop.f32.mrf.mxu1  ;;  %v6568_v26 = vadd.f32 %v1944_v47, %v1704_v62 }
 0x196   : > { %v1977_v42 = vadd.f32 %v1976_v15, %v1957_v10  ;;  %v6619_v10 = vperm.slane %v2878_v38, 0 }
 0x198   : > { %v6566_v44 = vadd.f32 %v1977_v42, %v1701_v17 }
 0x19a   : > { %v2222_v30 = vpop.f32.mrf.mxu3 }
 0x19b   : > { %v1962_v48 = vpop.f32.mrf.mxu0  ;;  %v2223_v37 = vadd.f32 %v2222_v30, %v2203_v6 }
 0x19d   : > { %v1979_v45 = vpop.f32.mrf.mxu2  ;;  %v2205_v51 = vpop.f32.mrf.mxu1  ;;  %v2270_v25 = vadd.f32 %v2223_v37, %v6554_v20 }
 0x19e   : > { %v1980_v46 = vadd.f32 %v1979_v45, %v1960_v4 }
 0x1a0   : > { %v6570_v50 = vadd.f32 %v1980_v46, %v1703_v24 }
 0x1a2   : > { %v2224_v54 = vpop.f32.mrf.mxu3 }
 0x1a3   : > { %v2241_v55 = vpop.f32.mrf.mxu0  ;;  %v2225_v15 = vadd.f32 %v2224_v54, %v2205_v51 }
 0x1a5   : > { %v1981_v41 = vpop.f32.mrf.mxu2  ;;  %v2208_v58 = vpop.f32.mrf.mxu1  ;;  %v2272_v45 = vadd.f32 %v2225_v15, %v6559_v28 }
 0x1a6   : > { %v1982_v43 = vadd.f32 %v1981_v41, %v1962_v48 }
 0x1a8   : > { %v6572_v49 = vadd.f32 %v1982_v43, %v1705_v19 }
 0x1aa   : > { %v2227_v33 = vpop.f32.mrf.mxu3 }
 0x1ab   : > { %v6574_v31 = vpop.f32.mrf.mxu0 }
 0x1ad   : > { %v2260_v39 = vpop.f32.mrf.mxu2  ;;  %v6576_v12 = vpop.f32.mrf.mxu1 }
 0x1ae   : > { %v2261_v54 = vadd.f32 %v2260_v39, %v2241_v55 }
 0x1b2   : > { %v6580_v2 = vpop.f32.mrf.mxu3 }
 0x1b3   : > { %v6582_v11 = vpop.f32.mrf.mxu0 }
 0x1b5   : > { %v6578_v14 = vpop.f32.mrf.mxu2  ;;  %v2489_v13 = vpop.f32.mrf.mxu1 }
 0x1ba   : > { %v2508_v1 = vpop.f32.mrf.mxu3 }
 0x1bb   : > { %v6586_v53 = vpop.f32.mrf.mxu0  ;;  %v2509_v22 = vadd.f32 %v2508_v1, %v2489_v13  ;;  %v2228_v13 = vadd.f32 %v2227_v33, %v2208_v58 }
 0x1bd   : > { %v6584_v35 = vpop.f32.mrf.mxu2  ;;  %v2491_v16 = vpop.f32.mrf.mxu1  ;;  %v2556_v0 = vadd.f32 %v2509_v22, %v2270_v25  ;;  %v2271_v22 = vadd.f32 %v2261_v54, %v6562_v40  ;;  %v2274_v25 = vadd.f32 %v2228_v13, %v6564_v27  ;;  %v2230_v27 = vadd.f32 %v6580_v2, %v6576_v12 }
 0x1bf   : > { %v2276_v12 = vadd.f32 %v2230_v27, %v6568_v26 }
 0x1c2   : > { %v2510_v17 = vpop.f32.mrf.mxu3 }
 0x1c3   : > { %v2527_v62 = vpop.f32.mrf.mxu0  ;;  %v2511_v4 = vadd.f32 %v2510_v17, %v2491_v16 }
 0x1c5   : > { %v6588_v60 = vpop.f32.mrf.mxu2  ;;  %v2494_v7 = vpop.f32.mrf.mxu1  ;;  %v2558_v51 = vadd.f32 %v2511_v4, %v2272_v45 }
 0x1ca   : > { %v2513_v23 = vpop.f32.mrf.mxu3 }
 0x1cb   : > { %v6590_v57 = vpop.f32.mrf.mxu0 }
 0x1cd   : > { %v2546_v52 = vpop.f32.mrf.mxu2  ;;  %v6592_v61 = vpop.f32.mrf.mxu1 }
 0x1ce   : > { %v2547_v16 = vadd.f32 %v2546_v52, %v2527_v62  ;;  %v6644_v52 = vperm.slane %v2878_v38, 1 }
 0x1d0   : > { %v2557_v33 = vadd.f32 %v2547_v16, %v2271_v22 }
 0x1d2   : > { %v6599_v18 = vpop.f32.mrf.mxu3 }
 0x1d3   : > { %v6601_v9 = vpop.f32.mrf.mxu0 }
 0x1d5   : > { %v6594_v3 = vpop.f32.mrf.mxu2  ;;  %v2775_v5 = vpop.f32.mrf.mxu1 }
 0x1d7   : > { %v6597_v8 = vpop.permute.xlu0 %4626 }
 0x1d8   : > { %v4629_v24 = vunpack.i.h.bf16 %v6597_v8  ;;  %v4628_v32 = vunpack.i.l.bf16 %v6597_v8 }
 0x1da   : > { %v2932_v21 = vsel %vm545_vm0, %v4628_v32, %v4629_v24  ;;  %v2794_v19 = vpop.f32.mrf.mxu3  ;;  %v2514_v24 = vadd.f32 %v2513_v23, %v2494_v7  ;;  %v2263_v23 = vadd.f32 %v6578_v14, %v6574_v31  ;;  %v2516_v31 = vadd.f32 %v6599_v18, %v6592_v61 }
 0x1db   : > { %2950 = vst [vmem:[%s6608_s26 + $0x10] sm:$0xff] %v2932_v21  ;;  %v6617_v56 = vpop.f32.mrf.mxu0  ;;  %v2795_v59 = vadd.f32 %v2794_v19, %v2775_v5 }
 0x1dc   : > { %v2560_v19 = vadd.f32 %v2514_v24, %v2274_v25  ;;  %v2273_v38 = vadd.f32 %v2263_v23, %v6566_v44  ;;  %v2562_v18 = vadd.f32 %v2516_v31, %v2276_v12 }
 0x1dd   : > { %v6615_v29 = vpop.f32.mrf.mxu2  ;;  %v2777_v63 = vpop.f32.mrf.mxu1  ;;  %v2842_v34 = vadd.f32 %v2795_v59, %v2556_v0  ;;  %v2549_v59 = vadd.f32 %v6594_v3, %v6590_v57 }
 0x1de   : > { %v2552_v8 = vadd.f32 %v6615_v29, %v6601_v9  ;;  %v2268_v9 = vadd.f32 %v6588_v60, %v6586_v53 }
 0x1df   : > { %v2884_v47 = vadd.f32 %v6619_v10, %v2842_v34  ;;  %v2559_v2 = vadd.f32 %v2549_v59, %v2273_v38 }
 0x1e1   : > { %v2892_v46 = vmax.f32 %v2884_v47, 0.0 }
 0x1e2   : > { %v2796_v48 = vpop.f32.mrf.mxu3 }
 0x1e3   : > { %v6621_v36 = vpop.permute.xlu0 %4631  ;;  %2948 = vst [vmem:[%s6608_s26] sm:$0xff] %v2892_v46  ;;  %v2797_v41 = vadd.f32 %v2796_v48, %v2777_v63  ;;  %v2813_v43 = vpop.f32.mrf.mxu0 }
 0x1e4   : > { %v4634_v42 = vunpack.i.h.bf16 %v6621_v36  ;;  %v4633_v20 = vunpack.i.l.bf16 %v6621_v36  ;;  %v2277_v36 = vadd.f32 %v2268_v9, %v6572_v49 }
 0x1e5   : > { %v6631_v30 = vpop.f32.mrf.mxu2  ;;  %v2844_v1 = vadd.f32 %v2797_v41, %v2558_v51  ;;  %v2780_v17 = vpop.f32.mrf.mxu1  ;;  %v2266_v51 = vadd.f32 %v6584_v35, %v6582_v11 }
 0x1e6   : > { %v2933_v6 = vsel %vm545_vm0, %v4633_v20, %v4634_v42 }
 0x1e7   : > { %2953 = vst [vmem:[%s6608_s26 + $0x28] sm:$0xff] %v2933_v6  ;;  %v2886_v28 = vadd.f32 %v6619_v10, %v2844_v1  ;;  %v2275_v1 = vadd.f32 %v2266_v51, %v6570_v50  ;;  %v2554_v50 = vadd.f32 %v6631_v30, %v6617_v56 }
 0x1e9   : > { %v6634_v5 = vpop.permute.xlu1 %4636  ;;  %v2894_v55 = vmax.f32 %v2886_v28, 0.0  ;;  %v2563_v25 = vadd.f32 %v2554_v50, %v2277_v36 }
 0x1ea   : > { %v4639_v37 = vunpack.i.h.bf16 %v6634_v5  ;;  %v4638_v21 = vunpack.i.l.bf16 %v6634_v5  ;;  %v2799_v62 = vpop.f32.mrf.mxu3 }
 0x1eb   : > { %2951 = vst [vmem:[%s6608_s26 + $0x18] sm:$0xff] %v2894_v55  ;;  %v2800_v40 = vadd.f32 %v2799_v62, %v2780_v17  ;;  %v2815_v15 = vpop.f32.mrf.mxu0  ;;  %v2561_v17 = vadd.f32 %v2552_v8, %v2275_v1 }
 0x1ec   : > { %v2934_v39 = vsel %vm545_vm0, %v4638_v21, %v4639_v37 }
 0x1ed   : > { %v2832_v58 = vpop.f32.mrf.mxu2  ;;  %2956 = vst [vmem:[%s6608_s26 + $0x40] sm:$0xff] %v2934_v39  ;;  %v2846_v63 = vadd.f32 %v2800_v40, %v2560_v19  ;;  %v2782_v4 = vpop.f32.mrf.mxu1 }
 0x1ee   : > { %v2833_v7 = vadd.f32 %v2832_v58, %v2813_v43 }
 0x1ef   : > { %v2888_v14 = vadd.f32 %v6619_v10, %v2846_v63 }
 0x1f0   : > { %v2843_v0 = vadd.f32 %v2833_v7, %v2557_v33 }
 0x1f1   : > { %v2896_v47 = vmax.f32 %v2888_v14, 0.0 }
 0x1f2   : > { %v2885_v34 = vadd.f32 %v6644_v52, %v2843_v0  ;;  %v2801_v6 = vpop.f32.mrf.mxu3 }
 0x1f3   : > { %v4642_v3 = vpop.permute.xlu1 %4641  ;;  %2954 = vst [vmem:[%s6608_s26 + $0x30] sm:$0xff] %v2896_v47  ;;  %v2802_v48 = vadd.f32 %v2801_v6, %v2782_v4  ;;  %v2818_v13 = vpop.f32.mrf.mxu0 }
 0x1f4   : > { %v2893_v42 = vmax.f32 %v2885_v34, 0.0  ;;  %v4644_v46 = vunpack.i.h.bf16 %v4642_v3  ;;  %v4643_v61 = vunpack.i.l.bf16 %v4642_v3 }
 0x1f5   : > { %v2834_v57 = vpop.f32.mrf.mxu2  ;;  %v2848_v43 = vadd.f32 %v2802_v48, %v2562_v18 }
 0x1f6   : > { %v2944_v44 = vsel %vm545_vm0, %v2893_v42, %v4628_v32  ;;  %v2835_v45 = vadd.f32 %v2834_v57, %v2815_v15  ;;  %v2935_v41 = vsel %vm545_vm0, %v4643_v61, %v4644_v46 }
 0x1f7   : > { %2949 = vst [vmem:[%s6608_s26 + $0x8] sm:$0xff] %v2944_v44  ;;  %v2890_v54 = vadd.f32 %v6619_v10, %v2848_v43 }
 0x1f8   : > { %v2845_v26 = vadd.f32 %v2835_v45, %v2559_v2  ;;  %2959 = vst [vmem:[%s6608_s26 + $0x58] sm:$0xff] %v2935_v41 }
 0x1f9   : > { %v2898_v35 = vmax.f32 %v2890_v54, 0.0 }
 0x1fa   : > { %v2887_v32 = vadd.f32 %v6644_v52, %v2845_v26 }
 0x1fb   : > { %2957 = vst [vmem:[%s6608_s26 + $0x48] sm:$0xff] %v2898_v35 }
 0x1fc   : > { %v2895_v11 = vmax.f32 %v2887_v32, 0.0 }
 0x1fd   : > { %v2837_v16 = vpop.f32.mrf.mxu2 }
 0x1fe   : > { %v2945_v24 = vsel %vm545_vm0, %v2895_v11, %v4633_v20  ;;  %v2838_v28 = vadd.f32 %v2837_v16, %v2818_v13  ;;  %v2820_v20 = vpop.f32.mrf.mxu0 }
 0x1ff   : > { %2952 = vst [vmem:[%s6608_s26 + $0x20] sm:$0xff] %v2945_v24 }
 0x200   : > { %v2847_v29 = vadd.f32 %v2838_v28, %v2561_v17 }
 0x202   : > { %v2889_v10 = vadd.f32 %v6644_v52, %v2847_v29 }
 0x204   : > { %v2897_v37 = vmax.f32 %v2889_v10, 0.0 }
 0x205   : > { %v2839_v22 = vpop.f32.mrf.mxu2 }
 0x206   : > { %v2946_v53 = vsel %vm545_vm0, %v2897_v37, %v4638_v21  ;;  %v2840_v60 = vadd.f32 %v2839_v22, %v2820_v20 }
 0x207   : > { %2955 = vst [vmem:[%s6608_s26 + $0x38] sm:$0xff] %v2946_v53 }
 0x208   : > { %v2849_v56 = vadd.f32 %v2840_v60, %v2563_v25 }
 0x20a   : > { %v2891_v49 = vadd.f32 %v6644_v52, %v2849_v56 }
 0x20c   : > { %v2899_v30 = vmax.f32 %v2891_v49, 0.0 }
 0x20e   : > { %v2947_v55 = vsel %vm545_vm0, %v2899_v30, %v4643_v61 }
 0x20f   : > { %2958 = vst [vmem:[%s6608_s26 + $0x50] sm:$0xff] %v2947_v55 }
 0x210   : > { %4672 = shalt.err (!%p4669_p5)
}
 0x211   : > { %s4710_s20 = smov 384   ;;  %s4711_s10 = smov 24  }
 0x212   : > { %4583 = dma.vmem_to_hbm [thread:$0]  (%p4770_p6), %s2975_s16, 1536, %s2977_s6, %s2961_s7, %s4710_s20, %s4710_s20, %s4711_s10  }
 0x213 PF: > { %p4589_p7 = scmp.ge.s32.totalorder %s4707_s15, 2  ;;  %s2991_s26 = sand.u32 1, %s4695_s12  }
 0x214   : > { %s2992_s27 = scalar_lea.sflag [#allocation4], %s2991_s26 }
 0x215   : > { %p4586_p9 = pnand %p4589_p7, %p4774_p8 }
 0x217   : > { %p4587_p10 = pneg %p4586_p9 }
 0x219   : > { %4690 = dma.done.wait (%p4587_p10), %s2992_s27, 1536  }
 0x21a   : > { %4692 = vsyncadd (%p4587_p10), %s2992_s27, 4294965760  ;;  %p13_p11 = scmp.ge.s32.totalorder %s4755_s18, 6   ;;  %s6732_s12 = smov %s4699_s13 }
 0x21b   : > { %s6733_s13 = smov %s4703_s14  ;;  %s6734_s14 = smov %s4768_s21 }
 0x21c   : > { %s6735_s15 = smov %s4755_s18  ;;  %15 = sbr.rel (!%p13_p11) target bundleno = 3 (0x3), region = 126 }
 0x221   :  { %2998 = vsyncpa [#allocation4], 1 }
 0x222   :  { %3000 = vsyncpa [#allocation4 + $0x1], 1 }

</bundles_post_ra>
